<compile_context>
chip_gen: v7x
topology: tpu7x:2x2x1
jax: 0.10.0
libtpu: 0.0.40
codegen_flags: <defaults>
</compile_context>

<pallas_src>
import functools

import jax
import jax.numpy as jnp
from jax.experimental import pallas as pl
from jax.experimental.pallas import tpu as pltpu


def simple_pointnet_kernel(p_ref,
                           w0_ref, b0_ref,
                           w1a_ref, w1b_ref, b1_ref,
                           w2a_ref, w2b_ref, b2_ref,
                           w3a_ref, w3b_ref, b3_ref,
                           wc_ref, bc_ref,
                           out_ref, *, act_dtype):
    # One grid step == bt point sets.  p_ref block is (bt, T, D) in bf16.
    Bt, T, D = p_ref.shape
    H = w0_ref.shape[1]

    def mm(a, w_ref):
        # bf16 operands on the MXU, f32 accumulation.
        return jnp.dot(a.astype(jnp.bfloat16), w_ref[...],
                       preferred_element_type=jnp.float32)

    relu = lambda a: jnp.maximum(a, 0)       # weak-typed 0 -> keeps operand dtype

    # With T a multiple of 16 this reshape (and the ones below) is a layout no-op.
    x = p_ref[...].reshape(Bt * T, D)                                  # (bt*T, D) bf16

    # net = fc_0(relu(p)); the fc_0 bias is per-row so it cannot be folded.
    net = (mm(relu(x), w0_ref) + b0_ref[...]).astype(act_dtype)        # (bt*T, H)

    # Three (maxpool over points -> concat -> fc) blocks, concat decomposed:
    #   fc(relu([net, pooled])) == relu(net) @ Wa + (max_T relu(net)) @ Wb + b
    # (relu and max commute).  Bias folded into the (bt,H) pooled term so only one
    # (bt*T,H) elementwise add remains per block.
    for wa_ref, wb_ref, b_ref in ((w1a_ref, w1b_ref, b1_ref),
                                  (w2a_ref, w2b_ref, b2_ref),
                                  (w3a_ref, w3b_ref, b3_ref)):
        r = relu(net)                                                  # (bt*T, H) act_dtype
        pooled_r = jnp.max(r.reshape(Bt, T, H), axis=1)                # (bt, H) == relu(max(net))
        bp = (mm(pooled_r, wb_ref) + b_ref[...]).astype(act_dtype)     # (bt, H) pooled term + bias
        net = (mm(r, wa_ref).astype(act_dtype).reshape(Bt, T, H)
               + bp[:, None, :]).reshape(Bt * T, H)

    # Final global max-pool over points, then fc_c over all bt pooled rows at once.
    pooled = jnp.max(relu(net).reshape(Bt, T, H), axis=1)              # (bt, H)
    c = mm(pooled, wc_ref) + bc_ref[...]                               # (bt, C_OUT) f32
    out_ref[...] = c.astype(out_ref.dtype)


def _tpu_generation():
    try:
        kind = jax.devices()[0].device_kind.lower()
    except Exception:
        return "other"
    if "v5 lite" in kind or "v5e" in kind or "v5lite" in kind:
        return "v5e"
    if "v6" in kind or "trillium" in kind:
        return "v6e"
    if "v7" in kind:
        return "v7x"
    return "other"


# per-generation defaults: (activation dtype, vmem limit, target rows/step, max rows/step,
#                           minimum grid length)
_GEN_CFG = {
    # v5e: MXU-bound, no bf16 VALU -> keep elementwise in f32; 128 MiB VMEM -> big tiles.
    "v5e":   (jnp.float32,  96 << 20, 4096, 8192, 1),
    # v6e: single TensorCore, native bf16 VALU, 128 MiB VMEM.
    "v6e":   (jnp.bfloat16, 96 << 20, 2048, 8192, 1),
    # v7x: 2 TensorCores (need grid >= 2 to use both), only 64 MiB VMEM -> tighter tiles.
    "v7x":   (jnp.bfloat16, 48 << 20, 1024, 4096, 2),
    "other": (jnp.bfloat16, 48 << 20, 1024, 2048, 2),
}


def _vmem_limit_bytes(default):
    """~3/4 of physical VMEM when the hardware query is available, else a safe default."""
    try:
        return int(pltpu.get_tpu_info().vmem_capacity_bytes * 3 // 4)
    except Exception:
        return default


def _choose_bt(B, T, *, target_rows, max_rows, min_grid):
    """Divisor bt of B such that bt*T reaches ~target_rows (fill the MXU M dim, amortize
    the ~0.35us/step overhead and per-step small-M weight pushes) without exceeding
    max_rows, while keeping at least `min_grid` grid steps (dual-TC v7x + DMA pipelining)."""
    cap = max(1, B // max(1, min_grid))
    divisors = [d for d in range(1, cap + 1) if B % d == 0]
    fitting = [d for d in divisors if d * T <= max_rows]
    if not fitting:
        return 1
    reaching = [d for d in fitting if d * T >= target_rows]
    return min(reaching) if reaching else max(fitting)


def simple_pointnet_forward(p, params, *, bt=None, act_dtype=None):
    """p: (B, T, D) float.  params: f32 dict (w*: (in, out), b*: (out,)) from init_params."""
    B, T, D = p.shape
    H = params["w0"].shape[1]
    C_OUT = params["wc"].shape[1]

    gen = _tpu_generation()
    cfg_act, cfg_vmem, target_rows, max_rows, min_grid = _GEN_CFG[gen]
    if act_dtype is None:
        act_dtype = cfg_act
    vmem_limit = _vmem_limit_bytes(cfg_vmem)

    # bf16 point cloud: a single fused cast (NO host-side pad pass).  The feature dim
    # stays at its native D; relu commutes with bf16 rounding so this matches the old
    # relu-then-cast-at-the-matmul numerics exactly.
    if p.dtype != jnp.bfloat16:
        p = p.astype(jnp.bfloat16)

    bf16, f32 = jnp.bfloat16, jnp.float32
    kp = dict(
        w0=params["w0"].astype(bf16),
        w1a=params["w1"][:H].astype(bf16), w1b=params["w1"][H:].astype(bf16),
        w2a=params["w2"][:H].astype(bf16), w2b=params["w2"][H:].astype(bf16),
        w3a=params["w3"][:H].astype(bf16), w3b=params["w3"][H:].astype(bf16),
        wc=params["wc"].astype(bf16),
        b0=params["b0"].reshape(1, H).astype(f32),
        b1=params["b1"].reshape(1, H).astype(f32),
        b2=params["b2"].reshape(1, H).astype(f32),
        b3=params["b3"].reshape(1, H).astype(f32),
        bc=params["bc"].reshape(1, C_OUT).astype(f32),
    )

    if bt is None:
        bt = _choose_bt(B, T, target_rows=target_rows, max_rows=max_rows, min_grid=min_grid)
    assert B % bt == 0, f"bt={bt} must divide B={B}"

    # Weights/biases: whole array, constant block index -> resident across the grid
    # (revisited blocks are not re-DMA'd).  On v7x one could additionally single-buffer
    # them (pipeline_mode=pl.Buffered(1)); skipped here since the weight footprint is
    # small relative to the p block.
    full = lambda arr: pl.BlockSpec(arr.shape, lambda b: (0,) * arr.ndim)

    weight_args = (kp["w0"], kp["b0"],
                   kp["w1a"], kp["w1b"], kp["b1"],
                   kp["w2a"], kp["w2b"], kp["b2"],
                   kp["w3a"], kp["w3b"], kp["b3"],
                   kp["wc"], kp["bc"])

    cost = pl.CostEstimate(
        flops=2 * B * T * (D * H + 3 * H * H) + 2 * B * (3 * H * H + H * C_OUT),
        transcendentals=0,
        bytes_accessed=int(p.size) * p.dtype.itemsize
        + sum(int(a.size) * a.dtype.itemsize for a in weight_args)
        + B * C_OUT * 4,
    )

    return pl.pallas_call(
        functools.partial(simple_pointnet_kernel, act_dtype=act_dtype),
        out_shape=jax.ShapeDtypeStruct((B, C_OUT), jnp.float32),
        grid_spec=pltpu.PrefetchScalarGridSpec(
            num_scalar_prefetch=0,
            grid=(B // bt,),
            in_specs=[pl.BlockSpec((bt, T, D), lambda b: (b, 0, 0))]   # bt point sets / step
                     + [full(a) for a in weight_args],
            out_specs=pl.BlockSpec((bt, C_OUT), lambda b: (b, 0)),
        ),
        compiler_params=pltpu.CompilerParams(
            dimension_semantics=("parallel",),
            vmem_limit_bytes=vmem_limit,
        ),
        cost_estimate=cost,
    )(p, *weight_args)


def init_params(key, dim, hidden_dim, c_out=128):
    """Deterministic kaiming-normal (fan_in, gain=sqrt(2)) weights, zero biases.
    Weights are stored already transposed: (in_features, out_features)."""
    def kaiming(key, fan_in, fan_out):
        std = (2.0 / fan_in) ** 0.5
        return std * jax.random.normal(key, (fan_in, fan_out), jnp.float32)

    keys = jax.random.split(key, 5)
    return {
        "w0": kaiming(keys[0], dim, hidden_dim),
        "b0": jnp.zeros((hidden_dim,), jnp.float32),
        "w1": kaiming(keys[1], 2 * hidden_dim, hidden_dim),
        "b1": jnp.zeros((hidden_dim,), jnp.float32),
        "w2": kaiming(keys[2], 2 * hidden_dim, hidden_dim),
        "b2": jnp.zeros((hidden_dim,), jnp.float32),
        "w3": kaiming(keys[3], 2 * hidden_dim, hidden_dim),
        "b3": jnp.zeros((hidden_dim,), jnp.float32),
        "wc": kaiming(keys[4], hidden_dim, c_out),
        "bc": jnp.zeros((c_out,), jnp.float32),
    }


def reference_forward(p, params):
    """Pure-JAX reference replicating the PyTorch forward semantics (explicit
    max-pool/expand/concat, f32 activations), with bf16 matmul operands + f32
    accumulation so it mirrors the kernel's MXU numerics."""
    relu = lambda a: jnp.maximum(a, 0.0)

    def lin(a, w, b):
        return jnp.dot(a.astype(jnp.bfloat16), w.astype(jnp.bfloat16),
                       preferred_element_type=jnp.float32) + b

    net = lin(relu(p), params["w0"], params["b0"])
    for k in ("1", "2", "3"):
        pooled = jnp.max(net, axis=1, keepdims=True)
        pooled = jnp.broadcast_to(pooled, net.shape)
        net = lin(relu(jnp.concatenate([net, pooled], axis=2)),
                  params["w" + k], params["b" + k])
    net = jnp.max(net, axis=1)
    return lin(relu(net), params["wc"], params["bc"])


if __name__ == "__main__":
    # Small, module-consistent shapes (reference defaults would be D=515, H=256, T large).
    # T is a multiple of 16 so the in-kernel reshapes stay layout no-ops even for bf16.
    B, T, D, H = 16, 16, 16, 32
    key = jax.random.PRNGKey(0)
    k_p, k_w = jax.random.split(key)

    p = jax.random.normal(k_p, (B, T, D), jnp.float32)
    params = init_params(k_w, D, H, c_out=128)
    ref = reference_forward(p, params)

    # bf16 activations carry ~0.5-1% error at the layer scale; compare relative to the
    # overall output magnitude for that path.
    loose_atol = 2.5e-2 * float(jnp.max(jnp.abs(ref)))

    # Default path: generation-selected activation dtype / tiling.
    out = jax.block_until_ready(simple_pointnet_forward(p, params))
    assert out.shape == (B, 128)
    assert jnp.allclose(out, ref, atol=loose_atol, rtol=2.5e-2), \
        "default path mismatch vs. JAX reference"

    # Exercise both activation-dtype code paths explicitly, whatever chip we run on.
    out_f32 = jax.block_until_ready(
        simple_pointnet_forward(p, params, act_dtype=jnp.float32))
    assert jnp.allclose(out_f32, ref, atol=2e-3, rtol=2e-3), \
        "f32-activation path mismatch vs. JAX reference"

    out_bf16 = jax.block_until_ready(
        simple_pointnet_forward(p, params, act_dtype=jnp.bfloat16))
    assert jnp.allclose(out_bf16, ref, atol=loose_atol, rtol=2.5e-2), \
        "bf16-activation path mismatch vs. JAX reference"

    print("KERNEL_OK")
</pallas_src>

<mosaic_0001>
module attributes {stable_mosaic.version = 11 : i64} {
  func.func @simple_pointnet_kernel(%arg0: i32, %arg1: memref<8x16x16xbf16, #tpu.memory_space<vmem>>, %arg2: memref<16x32xbf16, #tpu.memory_space<vmem>>, %arg3: memref<1x32xf32, #tpu.memory_space<vmem>>, %arg4: memref<32x32xbf16, #tpu.memory_space<vmem>>, %arg5: memref<32x32xbf16, #tpu.memory_space<vmem>>, %arg6: memref<1x32xf32, #tpu.memory_space<vmem>>, %arg7: memref<32x32xbf16, #tpu.memory_space<vmem>>, %arg8: memref<32x32xbf16, #tpu.memory_space<vmem>>, %arg9: memref<1x32xf32, #tpu.memory_space<vmem>>, %arg10: memref<32x32xbf16, #tpu.memory_space<vmem>>, %arg11: memref<32x32xbf16, #tpu.memory_space<vmem>>, %arg12: memref<1x32xf32, #tpu.memory_space<vmem>>, %arg13: memref<32x128xbf16, #tpu.memory_space<vmem>>, %arg14: memref<1x128xf32, #tpu.memory_space<vmem>>, %arg15: memref<8x128xf32, #tpu.memory_space<vmem>>) attributes {dimension_semantics = [#tpu.dimension_semantics<parallel>], iteration_bounds = array<i64: 2>, scalar_prefetch = 0 : i64, scratch_operands = 0 : i64, tpu.core_type = #tpu.core_type<tc>, window_params = [{transform_indices = @transform_0, window_bounds = array<i64: 8, 16, 16>}, {pipeline_mode = #tpu.pipeline_mode<synchronous>, transform_indices = @transform_1, window_bounds = array<i64: 16, 32>}, {pipeline_mode = #tpu.pipeline_mode<synchronous>, transform_indices = @transform_2, window_bounds = array<i64: 1, 32>}, {pipeline_mode = #tpu.pipeline_mode<synchronous>, transform_indices = @transform_3, window_bounds = array<i64: 32, 32>}, {pipeline_mode = #tpu.pipeline_mode<synchronous>, transform_indices = @transform_4, window_bounds = array<i64: 32, 32>}, {pipeline_mode = #tpu.pipeline_mode<synchronous>, transform_indices = @transform_5, window_bounds = array<i64: 1, 32>}, {pipeline_mode = #tpu.pipeline_mode<synchronous>, transform_indices = @transform_6, window_bounds = array<i64: 32, 32>}, {pipeline_mode = #tpu.pipeline_mode<synchronous>, transform_indices = @transform_7, window_bounds = array<i64: 32, 32>}, {pipeline_mode = #tpu.pipeline_mode<synchronous>, transform_indices = @transform_8, window_bounds = array<i64: 1, 32>}, {pipeline_mode = #tpu.pipeline_mode<synchronous>, transform_indices = @transform_9, window_bounds = array<i64: 32, 32>}, {pipeline_mode = #tpu.pipeline_mode<synchronous>, transform_indices = @transform_10, window_bounds = array<i64: 32, 32>}, {pipeline_mode = #tpu.pipeline_mode<synchronous>, transform_indices = @transform_11, window_bounds = array<i64: 1, 32>}, {pipeline_mode = #tpu.pipeline_mode<synchronous>, transform_indices = @transform_12, window_bounds = array<i64: 32, 128>}, {pipeline_mode = #tpu.pipeline_mode<synchronous>, transform_indices = @transform_13, window_bounds = array<i64: 1, 128>}, {transform_indices = @transform_14, window_bounds = array<i64: 8, 128>}]} {
    %c0 = arith.constant 0 : index
    %c0_0 = arith.constant 0 : index
    %c0_1 = arith.constant 0 : index
    %0 = vector.load %arg1[%c0, %c0_0, %c0_1] : memref<8x16x16xbf16, #tpu.memory_space<vmem>>, vector<8x16x16xbf16>
    %1 = vector.shape_cast %0 : vector<8x16x16xbf16> to vector<128x16xbf16>
    %cst = arith.constant 0.000000e+00 : bf16
    %2 = vector.broadcast %cst : bf16 to vector<128x16xbf16>
    %3 = arith.maximumf %1, %2 : vector<128x16xbf16>
    %c0_2 = arith.constant 0 : index
    %c0_3 = arith.constant 0 : index
    %4 = vector.load %arg2[%c0_2, %c0_3] : memref<16x32xbf16, #tpu.memory_space<vmem>>, vector<16x32xbf16>
    %cst_4 = arith.constant dense<0.000000e+00> : vector<128x32xf32>
    %5 = tpu.matmul %3, %4, %cst_4 {dimension_numbers = #tpu.dot_dimension_numbers<[1], [0], [0], [1], [0, 0, 1, 1], [], []>} : vector<128x16xbf16>, vector<16x32xbf16>, vector<128x32xf32> -> vector<128x32xf32>
    %c0_5 = arith.constant 0 : index
    %c0_6 = arith.constant 0 : index
    %6 = vector.load %arg3[%c0_5, %c0_6] : memref<1x32xf32, #tpu.memory_space<vmem>>, vector<1x32xf32>
    %7 = vector.broadcast %6 : vector<1x32xf32> to vector<128x32xf32>
    %8 = arith.addf %5, %7 : vector<128x32xf32>
    %9 = arith.truncf %8 : vector<128x32xf32> to vector<128x32xbf16>
    %cst_7 = arith.constant 0.000000e+00 : bf16
    %10 = vector.broadcast %cst_7 : bf16 to vector<128x32xbf16>
    %11 = arith.maximumf %9, %10 : vector<128x32xbf16>
    %12 = vector.shape_cast %11 : vector<128x32xbf16> to vector<8x16x32xbf16>
    %cst_8 = arith.constant dense<0xFF80> : vector<8x32xbf16>
    %13 = vector.multi_reduction <maximumf>, %12, %cst_8 [1] : vector<8x16x32xbf16> to vector<8x32xbf16>
    %c0_9 = arith.constant 0 : index
    %c0_10 = arith.constant 0 : index
    %14 = vector.load %arg5[%c0_9, %c0_10] : memref<32x32xbf16, #tpu.memory_space<vmem>>, vector<32x32xbf16>
    %cst_11 = arith.constant dense<0.000000e+00> : vector<8x32xf32>
    %15 = tpu.matmul %13, %14, %cst_11 {dimension_numbers = #tpu.dot_dimension_numbers<[1], [0], [0], [1], [0, 0, 1, 1], [], []>} : vector<8x32xbf16>, vector<32x32xbf16>, vector<8x32xf32> -> vector<8x32xf32>
    %c0_12 = arith.constant 0 : index
    %c0_13 = arith.constant 0 : index
    %16 = vector.load %arg6[%c0_12, %c0_13] : memref<1x32xf32, #tpu.memory_space<vmem>>, vector<1x32xf32>
    %17 = vector.broadcast %16 : vector<1x32xf32> to vector<8x32xf32>
    %18 = arith.addf %15, %17 : vector<8x32xf32>
    %19 = arith.truncf %18 : vector<8x32xf32> to vector<8x32xbf16>
    %c0_14 = arith.constant 0 : index
    %c0_15 = arith.constant 0 : index
    %20 = vector.load %arg4[%c0_14, %c0_15] : memref<32x32xbf16, #tpu.memory_space<vmem>>, vector<32x32xbf16>
    %cst_16 = arith.constant dense<0.000000e+00> : vector<128x32xf32>
    %21 = tpu.matmul %11, %20, %cst_16 {dimension_numbers = #tpu.dot_dimension_numbers<[1], [0], [0], [1], [0, 0, 1, 1], [], []>} : vector<128x32xbf16>, vector<32x32xbf16>, vector<128x32xf32> -> vector<128x32xf32>
    %22 = arith.truncf %21 : vector<128x32xf32> to vector<128x32xbf16>
    %23 = vector.shape_cast %22 : vector<128x32xbf16> to vector<8x16x32xbf16>
    %24 = vector.shape_cast %19 : vector<8x32xbf16> to vector<8x1x32xbf16>
    %25 = vector.broadcast %24 : vector<8x1x32xbf16> to vector<8x16x32xbf16>
    %26 = arith.addf %23, %25 : vector<8x16x32xbf16>
    %27 = vector.shape_cast %26 : vector<8x16x32xbf16> to vector<128x32xbf16>
    %cst_17 = arith.constant 0.000000e+00 : bf16
    %28 = vector.broadcast %cst_17 : bf16 to vector<128x32xbf16>
    %29 = arith.maximumf %27, %28 : vector<128x32xbf16>
    %30 = vector.shape_cast %29 : vector<128x32xbf16> to vector<8x16x32xbf16>
    %cst_18 = arith.constant dense<0xFF80> : vector<8x32xbf16>
    %31 = vector.multi_reduction <maximumf>, %30, %cst_18 [1] : vector<8x16x32xbf16> to vector<8x32xbf16>
    %c0_19 = arith.constant 0 : index
    %c0_20 = arith.constant 0 : index
    %32 = vector.load %arg8[%c0_19, %c0_20] : memref<32x32xbf16, #tpu.memory_space<vmem>>, vector<32x32xbf16>
    %cst_21 = arith.constant dense<0.000000e+00> : vector<8x32xf32>
    %33 = tpu.matmul %31, %32, %cst_21 {dimension_numbers = #tpu.dot_dimension_numbers<[1], [0], [0], [1], [0, 0, 1, 1], [], []>} : vector<8x32xbf16>, vector<32x32xbf16>, vector<8x32xf32> -> vector<8x32xf32>
    %c0_22 = arith.constant 0 : index
    %c0_23 = arith.constant 0 : index
    %34 = vector.load %arg9[%c0_22, %c0_23] : memref<1x32xf32, #tpu.memory_space<vmem>>, vector<1x32xf32>
    %35 = vector.broadcast %34 : vector<1x32xf32> to vector<8x32xf32>
    %36 = arith.addf %33, %35 : vector<8x32xf32>
    %37 = arith.truncf %36 : vector<8x32xf32> to vector<8x32xbf16>
    %c0_24 = arith.constant 0 : index
    %c0_25 = arith.constant 0 : index
    %38 = vector.load %arg7[%c0_24, %c0_25] : memref<32x32xbf16, #tpu.memory_space<vmem>>, vector<32x32xbf16>
    %cst_26 = arith.constant dense<0.000000e+00> : vector<128x32xf32>
    %39 = tpu.matmul %29, %38, %cst_26 {dimension_numbers = #tpu.dot_dimension_numbers<[1], [0], [0], [1], [0, 0, 1, 1], [], []>} : vector<128x32xbf16>, vector<32x32xbf16>, vector<128x32xf32> -> vector<128x32xf32>
    %40 = arith.truncf %39 : vector<128x32xf32> to vector<128x32xbf16>
    %41 = vector.shape_cast %40 : vector<128x32xbf16> to vector<8x16x32xbf16>
    %42 = vector.shape_cast %37 : vector<8x32xbf16> to vector<8x1x32xbf16>
    %43 = vector.broadcast %42 : vector<8x1x32xbf16> to vector<8x16x32xbf16>
    %44 = arith.addf %41, %43 : vector<8x16x32xbf16>
    %45 = vector.shape_cast %44 : vector<8x16x32xbf16> to vector<128x32xbf16>
    %cst_27 = arith.constant 0.000000e+00 : bf16
    %46 = vector.broadcast %cst_27 : bf16 to vector<128x32xbf16>
    %47 = arith.maximumf %45, %46 : vector<128x32xbf16>
    %48 = vector.shape_cast %47 : vector<128x32xbf16> to vector<8x16x32xbf16>
    %cst_28 = arith.constant dense<0xFF80> : vector<8x32xbf16>
    %49 = vector.multi_reduction <maximumf>, %48, %cst_28 [1] : vector<8x16x32xbf16> to vector<8x32xbf16>
    %c0_29 = arith.constant 0 : index
    %c0_30 = arith.constant 0 : index
    %50 = vector.load %arg11[%c0_29, %c0_30] : memref<32x32xbf16, #tpu.memory_space<vmem>>, vector<32x32xbf16>
    %cst_31 = arith.constant dense<0.000000e+00> : vector<8x32xf32>
    %51 = tpu.matmul %49, %50, %cst_31 {dimension_numbers = #tpu.dot_dimension_numbers<[1], [0], [0], [1], [0, 0, 1, 1], [], []>} : vector<8x32xbf16>, vector<32x32xbf16>, vector<8x32xf32> -> vector<8x32xf32>
    %c0_32 = arith.constant 0 : index
    %c0_33 = arith.constant 0 : index
    %52 = vector.load %arg12[%c0_32, %c0_33] : memref<1x32xf32, #tpu.memory_space<vmem>>, vector<1x32xf32>
    %53 = vector.broadcast %52 : vector<1x32xf32> to vector<8x32xf32>
    %54 = arith.addf %51, %53 : vector<8x32xf32>
    %55 = arith.truncf %54 : vector<8x32xf32> to vector<8x32xbf16>
    %c0_34 = arith.constant 0 : index
    %c0_35 = arith.constant 0 : index
    %56 = vector.load %arg10[%c0_34, %c0_35] : memref<32x32xbf16, #tpu.memory_space<vmem>>, vector<32x32xbf16>
    %cst_36 = arith.constant dense<0.000000e+00> : vector<128x32xf32>
    %57 = tpu.matmul %47, %56, %cst_36 {dimension_numbers = #tpu.dot_dimension_numbers<[1], [0], [0], [1], [0, 0, 1, 1], [], []>} : vector<128x32xbf16>, vector<32x32xbf16>, vector<128x32xf32> -> vector<128x32xf32>
    %58 = arith.truncf %57 : vector<128x32xf32> to vector<128x32xbf16>
    %59 = vector.shape_cast %58 : vector<128x32xbf16> to vector<8x16x32xbf16>
    %60 = vector.shape_cast %55 : vector<8x32xbf16> to vector<8x1x32xbf16>
    %61 = vector.broadcast %60 : vector<8x1x32xbf16> to vector<8x16x32xbf16>
    %62 = arith.addf %59, %61 : vector<8x16x32xbf16>
    %63 = vector.shape_cast %62 : vector<8x16x32xbf16> to vector<128x32xbf16>
    %cst_37 = arith.constant 0.000000e+00 : bf16
    %64 = vector.broadcast %cst_37 : bf16 to vector<128x32xbf16>
    %65 = arith.maximumf %63, %64 : vector<128x32xbf16>
    %66 = vector.shape_cast %65 : vector<128x32xbf16> to vector<8x16x32xbf16>
    %cst_38 = arith.constant dense<0xFF80> : vector<8x32xbf16>
    %67 = vector.multi_reduction <maximumf>, %66, %cst_38 [1] : vector<8x16x32xbf16> to vector<8x32xbf16>
    %c0_39 = arith.constant 0 : index
    %c0_40 = arith.constant 0 : index
    %68 = vector.load %arg13[%c0_39, %c0_40] : memref<32x128xbf16, #tpu.memory_space<vmem>>, vector<32x128xbf16>
    %cst_41 = arith.constant dense<0.000000e+00> : vector<8x128xf32>
    %69 = tpu.matmul %67, %68, %cst_41 {dimension_numbers = #tpu.dot_dimension_numbers<[1], [0], [0], [1], [0, 0, 1, 1], [], []>} : vector<8x32xbf16>, vector<32x128xbf16>, vector<8x128xf32> -> vector<8x128xf32>
    %c0_42 = arith.constant 0 : index
    %c0_43 = arith.constant 0 : index
    %70 = vector.load %arg14[%c0_42, %c0_43] : memref<1x128xf32, #tpu.memory_space<vmem>>, vector<1x128xf32>
    %71 = vector.broadcast %70 : vector<1x128xf32> to vector<8x128xf32>
    %72 = arith.addf %69, %71 : vector<8x128xf32>
    %c0_44 = arith.constant 0 : index
    %c0_45 = arith.constant 0 : index
    %73 = vector.load %arg15[%c0_44, %c0_45] : memref<8x128xf32, #tpu.memory_space<vmem>>, vector<8x128xf32>
    tpu.vector_store %arg15[%c0_44, %c0_45], %72 {strides = array<i32>} : memref<8x128xf32, #tpu.memory_space<vmem>>, vector<8x128xf32>,
    return
  }
  func.func @transform_0(%arg0: i32) -> (i32, i32, i32) {
    %c0_i32 = arith.constant 0 : i32
    %c0_i32_0 = arith.constant 0 : i32
    %c0_i32_1 = arith.constant 0 : i32
    return %arg0, %c0_i32, %c0_i32_0 : i32, i32, i32
  }
  func.func @transform_1(%arg0: i32) -> (i32, i32) {
    %c0_i32 = arith.constant 0 : i32
    %c0_i32_0 = arith.constant 0 : i32
    %c0_i32_1 = arith.constant 0 : i32
    return %c0_i32, %c0_i32_0 : i32, i32
  }
  func.func @transform_2(%arg0: i32) -> (i32, i32) {
    %c0_i32 = arith.constant 0 : i32
    %c0_i32_0 = arith.constant 0 : i32
    %c0_i32_1 = arith.constant 0 : i32
    return %c0_i32, %c0_i32_0 : i32, i32
  }
  func.func @transform_3(%arg0: i32) -> (i32, i32) {
    %c0_i32 = arith.constant 0 : i32
    %c0_i32_0 = arith.constant 0 : i32
    %c0_i32_1 = arith.constant 0 : i32
    return %c0_i32, %c0_i32_0 : i32, i32
  }
  func.func @transform_4(%arg0: i32) -> (i32, i32) {
    %c0_i32 = arith.constant 0 : i32
    %c0_i32_0 = arith.constant 0 : i32
    %c0_i32_1 = arith.constant 0 : i32
    return %c0_i32, %c0_i32_0 : i32, i32
  }
  func.func @transform_5(%arg0: i32) -> (i32, i32) {
    %c0_i32 = arith.constant 0 : i32
    %c0_i32_0 = arith.constant 0 : i32
    %c0_i32_1 = arith.constant 0 : i32
    return %c0_i32, %c0_i32_0 : i32, i32
  }
  func.func @transform_6(%arg0: i32) -> (i32, i32) {
    %c0_i32 = arith.constant 0 : i32
    %c0_i32_0 = arith.constant 0 : i32
    %c0_i32_1 = arith.constant 0 : i32
    return %c0_i32, %c0_i32_0 : i32, i32
  }
  func.func @transform_7(%arg0: i32) -> (i32, i32) {
    %c0_i32 = arith.constant 0 : i32
    %c0_i32_0 = arith.constant 0 : i32
    %c0_i32_1 = arith.constant 0 : i32
    return %c0_i32, %c0_i32_0 : i32, i32
  }
  func.func @transform_8(%arg0: i32) -> (i32, i32) {
    %c0_i32 = arith.constant 0 : i32
    %c0_i32_0 = arith.constant 0 : i32
    %c0_i32_1 = arith.constant 0 : i32
    return %c0_i32, %c0_i32_0 : i32, i32
  }
  func.func @transform_9(%arg0: i32) -> (i32, i32) {
    %c0_i32 = arith.constant 0 : i32
    %c0_i32_0 = arith.constant 0 : i32
    %c0_i32_1 = arith.constant 0 : i32
    return %c0_i32, %c0_i32_0 : i32, i32
  }
  func.func @transform_10(%arg0: i32) -> (i32, i32) {
    %c0_i32 = arith.constant 0 : i32
    %c0_i32_0 = arith.constant 0 : i32
    %c0_i32_1 = arith.constant 0 : i32
    return %c0_i32, %c0_i32_0 : i32, i32
  }
  func.func @transform_11(%arg0: i32) -> (i32, i32) {
    %c0_i32 = arith.constant 0 : i32
    %c0_i32_0 = arith.constant 0 : i32
    %c0_i32_1 = arith.constant 0 : i32
    return %c0_i32, %c0_i32_0 : i32, i32
  }
  func.func @transform_12(%arg0: i32) -> (i32, i32) {
    %c0_i32 = arith.constant 0 : i32
    %c0_i32_0 = arith.constant 0 : i32
    %c0_i32_1 = arith.constant 0 : i32
    return %c0_i32, %c0_i32_0 : i32, i32
  }
  func.func @transform_13(%arg0: i32) -> (i32, i32) {
    %c0_i32 = arith.constant 0 : i32
    %c0_i32_0 = arith.constant 0 : i32
    %c0_i32_1 = arith.constant 0 : i32
    return %c0_i32, %c0_i32_0 : i32, i32
  }
  func.func @transform_14(%arg0: i32) -> (i32, i32) {
    %c0_i32 = arith.constant 0 : i32
    %c0_i32_0 = arith.constant 0 : i32
    return %arg0, %c0_i32 : i32, i32
  }
}

</mosaic_0001>

<bundles_post_ra>
// kernel: tpu_custom_call.1
= control target key start
LH: loop header
LB: loop body
LE: loop exit
PB: predicated region body
PF: predicated region fallthrough
CT: control target
= control target key end

     0   :  { %s4149_s0 = inlined_call_operand.hbm [shape: bf16[16,16,16], index: 0, kind: input, shape index: {}]   ;;  %s4150_s1 = inlined_call_operand.hbm [shape: bf16[16,32], index: 1, kind: input, shape index: {}]   ;;  %s4151_s2 = inlined_call_operand.vmem [shape: f32[1,32], index: 2, kind: input, shape index: {}]   ;;  %s4152_s3 = inlined_call_operand.hbm [shape: bf16[32,32], index: 3, kind: input, shape index: {}]   ;;  %s4153_s4 = inlined_call_operand.hbm [shape: bf16[32,32], index: 4, kind: input, shape index: {}]   ;;  %s4154_s5 = inlined_call_operand.vmem [shape: f32[1,32], index: 5, kind: input, shape index: {}]   ;;  %s4155_s6 = inlined_call_operand.vmem [shape: bf16[32,32], index: 6, kind: input, shape index: {}]   ;;  %s4156_s7 = inlined_call_operand.hbm [shape: bf16[32,32], index: 7, kind: input, shape index: {}]   ;;  %s4157_s8 = inlined_call_operand.hbm [shape: f32[1,32], index: 8, kind: input, shape index: {}]   ;;  %s4158_s9 = inlined_call_operand.vmem [shape: bf16[32,32], index: 9, kind: input, shape index: {}]   ;;  %s4159_s10 = inlined_call_operand.hbm [shape: bf16[32,32], index: 10, kind: input, shape index: {}]   ;;  %s4160_s11 = inlined_call_operand.vmem [shape: f32[1,32], index: 11, kind: input, shape index: {}]   ;;  %s4161_s12 = inlined_call_operand.hbm [shape: bf16[32,128], index: 12, kind: input, shape index: {}]   ;;  %s4162_s13 = inlined_call_operand.vmem [shape: f32[1,128], index: 13, kind: input, shape index: {}]   ;;  %s4163_s14 = inlined_call_operand.hbm [shape: f32[16,128], index: 14, kind: output, shape index: {}]  }
   0x1   :  { %4173 = sst [smem:[#allocation23_spill]] %s4150_s1 }
   0x2   :  { %4174 = sst [smem:[#allocation24_spill]] %s4154_s5 }
   0x3   :  { %4175 = sst [smem:[#allocation25_spill]] %s4155_s6 }
   0x4   :  { %4176 = sst [smem:[#allocation26_spill]] %s4158_s9 }
   0x5   :  { %4177 = sst [smem:[#allocation27_spill]] %s4160_s11 }
   0x6   :  { %4178 = sst [smem:[#allocation28_spill]] %s4162_s13 }
   0x7   :  { %4179 = sst [smem:[#allocation29_spill]] %s4163_s14 }
   0x8   :  { %19 = vsyncpa [#allocation3], 0 }
   0x9   :  { %21 = vsyncpa [#allocation3 + $0x1], 0 }
   0xa   :  { %22 = vsyncpa [#allocation6], 0 }
   0xb   :  { %23 = vsyncpa [#allocation9], 0 }
   0xc   :  { %24 = vsyncpa [#allocation12], 0 }
   0xd   :  { %25 = vsyncpa [#allocation15], 0 }
   0xe   :  { %26 = vsyncpa [#allocation4], 0 }
   0xf   :  { %28 = vsyncpa [#allocation4 + $0x1], 0  ;;  %s3406_s29 = smov 0   ;;  %s3408_s30 = smov 0  }
  0x10   :  { %s3410_s15 = smov 0   ;;  %s3412_s16 = smov 0  }
  0x11 LB: > { %s3316_s17 = smov [#allocation5]   ;;  %s3427_s19 = sadd.s32 4294967295, %s3314_s16   ;;  %s3314_s16 = sphi %s3412_s16, %s4212_s16   ;;  %s3310_s15 = sphi %s3410_s15, %s4211_s15   ;;  %s3306_s30 = sphi %s3408_s30, %s4210_s30   ;;  %s3302_s29 = sphi %s3406_s29, %s4209_s29  }
  0x12   : > { %s376_s18 = sshll.u32 %s3316_s17, 4  ;;  %p2602_p0 = scmp.ge.s32.totalorder %s3314_s16, 1  ;;  %s3432_s18 = int_to_ptr.vmem [resolvable:$true] %s376_s18 }
  0x13   : > { %p4169_p1 = scmp.eq.s32.totalorder %s3427_s19, 0  ;;  %p364_p2 = scmp.lt.s32.totalorder %s3314_s16, 3 }
  0x14   : > { %s3317_s21 = smov [#allocation8]   ;;  %s3318_s24 = smov [#allocation11]  }
  0x15   : > { %p3434_p3 = pnand %p2602_p0, %p364_p2  ;;  %s405_s22 = sshll.u32 %s3317_s21, 4  ;;  %s3447_s22 = int_to_ptr.vmem [resolvable:$true] %s405_s22 }
  0x16   : > { %s438_s25 = sshll.u32 %s3318_s24, 4  ;;  %s4182_s1 = sld [smem:[#allocation23_spill]]  ;;  %s3449_s25 = int_to_ptr.vmem [resolvable:$true] %s438_s25 }
  0x17   : > { %s4180_s20 = scalar_select %p3434_p3, 1, 0 }
  0x18   : > { %p2900_p5 = pneg %p3434_p3 }
  0x1a   : > { %p3443_p6 = pnand %p2900_p5, %p4169_p1 }
  0x1c   : > { %s3006_s28 = scalar_lea.hbm %s4182_s1, 128  ;;  %p3459_p8 = pneg %p3443_p6 }
  0x1d   : > { %p3007_p7 = scmp.ne.s32.totalorder %s4182_s1, %s3006_s28  ;;  %p3013_p11 = scmp.lt.u32.totalorder %s3006_s28, %s4182_s1 }
  0x1f   : > { %p3009_p9 = pnand %p3459_p8, %p3007_p7 }
  0x21   : > { %p3010_p10 = pneg %p3009_p9 }
  0x23   : > { %p3015_p12 = pnand %p3013_p11, %p3010_p10 }
  0x25   : > { %3018 = shalt.err (!%p3015_p12)
}
  0x26   : > { %s3019_s14 = scalar_lea.vmem %s3432_s18, 128  ;;  %p3027_p5 = scmp.lt.s32.totalorder %s3432_s18, %s3432_s18 }
  0x27   : > { %p3020_p13 = scmp.ne.s32.totalorder %s3432_s18, %s3019_s14  ;;  %p3028_p4 = scmp.lt.s32.totalorder %s3019_s14, %s3019_s14 }
  0x29   : > { %p3022_p0 = pnand %p3020_p13, %p3459_p8  ;;  %p3029_p7 = por %p3028_p4, %p3027_p5 }
  0x2b   : > { %p3023_p2 = pneg %p3022_p0 }
  0x2d   : > { %p3030_p9 = pnand %p3029_p7, %p3023_p2 }
  0x2f   : > { %3033 = shalt.err (!%p3030_p9)
}
  0x30   : > { %s4167_s26 = smov 64   ;;  %s4171_s13 = smov 4  }
  0x31   : > { %2903 = dma.hbm_to_vmem [thread:$0]  (!%p3443_p6), %s4182_s1, 128, %s3432_s18, [#allocation6], %s4167_s26, %s4167_s26, %s4171_s13  }
  0x32   : > { %s3034_s14 = scalar_lea.hbm %s4153_s4, 256 }
  0x33   : > { %p3035_p4 = scmp.ne.s32.totalorder %s4153_s4, %s3034_s14  ;;  %p3041_p12 = scmp.lt.u32.totalorder %s3034_s14, %s4153_s4 }
  0x35   : > { %p3037_p10 = pnand %p3035_p4, %p3459_p8 }
  0x37   : > { %p3038_p11 = pneg %p3037_p10 }
  0x39   : > { %p3043_p13 = pnand %p3041_p12, %p3038_p11 }
  0x3b   : > { %3046 = shalt.err (!%p3043_p13)
}
  0x3c   : > { %s3047_s18 = scalar_lea.vmem %s3447_s22, 256  ;;  %p3055_p7 = scmp.lt.s32.totalorder %s3447_s22, %s3447_s22 }
  0x3d   : > { %p3048_p0 = scmp.ne.s32.totalorder %s3447_s22, %s3047_s18  ;;  %p3056_p9 = scmp.lt.s32.totalorder %s3047_s18, %s3047_s18 }
  0x3f   : > { %p3050_p2 = pnand %p3048_p0, %p3459_p8  ;;  %p3057_p4 = por %p3056_p9, %p3055_p7 }
  0x41   : > { %p3051_p5 = pneg %p3050_p2 }
  0x43   : > { %p3058_p10 = pnand %p3057_p4, %p3051_p5 }
  0x45   : > { %3061 = shalt.err (!%p3058_p10)
}
  0x46   : > { %2909 = dma.hbm_to_vmem [thread:$0]  (!%p3443_p6), %s4153_s4, 256, %s3447_s22, [#allocation9], %s4167_s26, %s4167_s26, %s4171_s13  }
  0x47   : > { %s3062_s27 = scalar_lea.hbm %s4157_s8, 16 }
  0x48   : > { %p3063_p11 = scmp.ne.s32.totalorder %s4157_s8, %s3062_s27  ;;  %p3069_p0 = scmp.lt.u32.totalorder %s3062_s27, %s4157_s8 }
  0x4a   : > { %p3065_p12 = pnand %p3063_p11, %p3459_p8 }
  0x4c   : > { %p3066_p13 = pneg %p3065_p12 }
  0x4e   : > { %p3071_p2 = pnand %p3069_p0, %p3066_p13 }
  0x50   : > { %3074 = shalt.err (!%p3071_p2)
}
  0x51   : > { %s3075_s22 = scalar_lea.vmem %s3449_s25, 16  ;;  %s3082_s18 = scalar_lea.vmem %s3449_s25, 32 }
  0x52   : > { %p3076_p5 = scmp.ne.s32.totalorder %s3449_s25, %s3075_s22  ;;  %p3083_p4 = scmp.lt.s32.totalorder %s3449_s25, %s3449_s25 }
  0x53   : > { %p3084_p10 = scmp.lt.s32.totalorder %s3082_s18, %s3075_s22 }
  0x54   : > { %p3078_p7 = pnand %p3076_p5, %p3459_p8 }
  0x55   : > { %p3085_p11 = por %p3084_p10, %p3083_p4 }
  0x56   : > { %p3079_p9 = pneg %p3078_p7 }
  0x58   : > { %p3086_p12 = pnand %p3085_p11, %p3079_p9 }
  0x5a   : > { %3089 = shalt.err (!%p3086_p12)
}
  0x5b   : > { %2915 = dma.hbm_to_vmem [thread:$0]  (!%p3443_p6), %s4157_s8, 16, %s3449_s25, [#allocation12]  }
  0x5c   : > { %s3321_s9 = smov [#allocation7]   ;;  %s3322_s27 = smov [#allocation10]  }
  0x5d   : > { %s392_s11 = sshll.u32 %s3321_s9, 4  ;;  %s424_s28 = sshll.u32 %s3322_s27, 4  ;;  %s393_s11 = int_to_ptr.vmem [resolvable:$true] %s392_s11  ;;  %s425_s28 = int_to_ptr.vmem [resolvable:$true] %s424_s28 }
  0x5e   : > { %s3090_s14 = scalar_lea.hbm %s4152_s3, 256 }
  0x5f   : > { %p3091_p13 = scmp.ne.s32.totalorder %s4152_s3, %s3090_s14  ;;  %p3097_p5 = scmp.lt.u32.totalorder %s3090_s14, %s4152_s3 }
  0x61   : > { %p3093_p0 = pnand %p3091_p13, %p3459_p8 }
  0x63   : > { %p3094_p2 = pneg %p3093_p0 }
  0x65   : > { %p3099_p7 = pnand %p3097_p5, %p3094_p2 }
  0x67   : > { %3102 = shalt.err (!%p3099_p7)
}
  0x68   : > { %s3103_s25 = scalar_lea.vmem %s393_s11, 256  ;;  %p3111_p11 = scmp.lt.s32.totalorder %s393_s11, %s393_s11 }
  0x69   : > { %p3104_p9 = scmp.ne.s32.totalorder %s393_s11, %s3103_s25  ;;  %p3112_p12 = scmp.lt.s32.totalorder %s3103_s25, %s3103_s25 }
  0x6b   : > { %p3106_p4 = pnand %p3104_p9, %p3459_p8  ;;  %p3113_p1 = por %p3112_p12, %p3111_p11 }
  0x6d   : > { %p3107_p10 = pneg %p3106_p4 }
  0x6f   : > { %p3114_p3 = pnand %p3113_p1, %p3107_p10 }
  0x71   : > { %3117 = shalt.err (!%p3114_p3)
}
  0x72   : > { %s4184_s6 = smov 64   ;;  %s3118_s24 = scalar_lea.hbm %s4156_s7, 256 }
  0x73   : > { %2906 = dma.hbm_to_vmem [thread:$0]  (!%p3443_p6), %s4152_s3, 256, %s393_s11, [#allocation6], %s4184_s6, %s4184_s6, %s4171_s13  }
  0x74   : > { %p3119_p1 = scmp.ne.s32.totalorder %s4156_s7, %s3118_s24  ;;  %p3125_p0 = scmp.lt.u32.totalorder %s3118_s24, %s4156_s7 }
  0x76   : > { %p3121_p3 = pnand %p3119_p1, %p3459_p8 }
  0x78   : > { %p3122_p13 = pneg %p3121_p3 }
  0x7a   : > { %p3127_p2 = pnand %p3125_p0, %p3122_p13 }
  0x7c   : > { %3130 = shalt.err (!%p3127_p2)
}
  0x7d   : > { %s3131_s25 = scalar_lea.vmem %s425_s28, 256  ;;  %p3139_p4 = scmp.lt.s32.totalorder %s425_s28, %s425_s28 }
  0x7e   : > { %p3132_p5 = scmp.ne.s32.totalorder %s425_s28, %s3131_s25  ;;  %p3140_p10 = scmp.lt.s32.totalorder %s3131_s25, %s3131_s25 }
  0x80   : > { %p3134_p7 = pnand %p3132_p5, %p3459_p8  ;;  %p3141_p11 = por %p3140_p10, %p3139_p4 }
  0x82   : > { %p3135_p9 = pneg %p3134_p7 }
  0x84   : > { %p3142_p12 = pnand %p3141_p11, %p3135_p9 }
  0x86   : > { %3145 = shalt.err (!%p3142_p12)
}
  0x87   : > { %2912 = dma.hbm_to_vmem [thread:$0]  (!%p3443_p6), %s4156_s7, 256, %s425_s28, [#allocation9], %s4184_s6, %s4184_s6, %s4171_s13  }
  0x88   : > { %s3323_s9 = smov [#allocation13]   ;;  %s3324_s17 = smov [#allocation14]  }
  0x89   : > { %s451_s27 = sshll.u32 %s3323_s9, 4  ;;  %s467_s24 = sshll.u32 %s3324_s17, 4  ;;  %s452_s27 = int_to_ptr.vmem [resolvable:$true] %s451_s27  ;;  %s468_s24 = int_to_ptr.vmem [resolvable:$true] %s467_s24 }
  0x8a   : > { %s3146_s18 = scalar_lea.hbm %s4159_s10, 256 }
  0x8b   : > { %p3147_p1 = scmp.ne.s32.totalorder %s4159_s10, %s3146_s18  ;;  %p3153_p0 = scmp.lt.u32.totalorder %s3146_s18, %s4159_s10 }
  0x8d   : > { %p3149_p3 = pnand %p3147_p1, %p3459_p8 }
  0x8f   : > { %p3150_p13 = pneg %p3149_p3 }
  0x91   : > { %p3155_p2 = pnand %p3153_p0, %p3150_p13 }
  0x93   : > { %3158 = shalt.err (!%p3155_p2)
}
  0x94   : > { %s3159_s28 = scalar_lea.vmem %s452_s27, 256  ;;  %p3167_p4 = scmp.lt.s32.totalorder %s452_s27, %s452_s27 }
  0x95   : > { %p3160_p5 = scmp.ne.s32.totalorder %s452_s27, %s3159_s28  ;;  %p3168_p10 = scmp.lt.s32.totalorder %s3159_s28, %s3159_s28 }
  0x97   : > { %p3162_p7 = pnand %p3160_p5, %p3459_p8  ;;  %p3169_p11 = por %p3168_p10, %p3167_p4 }
  0x99   : > { %p3163_p9 = pneg %p3162_p7 }
  0x9b   : > { %p3170_p12 = pnand %p3169_p11, %p3163_p9 }
  0x9d   : > { %3173 = shalt.err (!%p3170_p12)
}
  0x9e   : > { %2918 = dma.hbm_to_vmem [thread:$0]  (!%p3443_p6), %s4159_s10, 256, %s452_s27, [#allocation12], %s4184_s6, %s4184_s6, %s4171_s13  }
  0x9f   : > { %s3174_s14 = scalar_lea.hbm %s4161_s12, 256 }
  0xa0   : > { %p3175_p1 = scmp.ne.s32.totalorder %s4161_s12, %s3174_s14  ;;  %p3181_p0 = scmp.lt.u32.totalorder %s3174_s14, %s4161_s12 }
  0xa2   : > { %p3177_p3 = pnand %p3175_p1, %p3459_p8 }
  0xa4   : > { %p3178_p13 = pneg %p3177_p3 }
  0xa6   : > { %p3183_p2 = pnand %p3181_p0, %p3178_p13 }
  0xa8   : > { %3186 = shalt.err (!%p3183_p2)
}
  0xa9   : > { %s3187_s11 = scalar_lea.vmem %s468_s24, 256  ;;  %p3195_p4 = scmp.lt.s32.totalorder %s468_s24, %s468_s24 }
  0xaa   : > { %p3188_p5 = scmp.ne.s32.totalorder %s468_s24, %s3187_s11  ;;  %p3196_p10 = scmp.lt.s32.totalorder %s3187_s11, %s3187_s11 }
  0xac   : > { %p3190_p7 = pnand %p3188_p5, %p3459_p8  ;;  %p3197_p11 = por %p3196_p10, %p3195_p4 }
  0xae   : > { %p3191_p9 = pneg %p3190_p7 }
  0xb0   : > { %p3198_p12 = pnand %p3197_p11, %p3191_p9 }
  0xb2   : > { %3201 = shalt.err (!%p3198_p12)
}
  0xb3   : > { %2921 = dma.hbm_to_vmem [thread:$0]  (!%p3443_p6), %s4161_s12, 256, %s468_s24, [#allocation15], %s4184_s6, %s4184_s6, %s4171_s13  }
  0xb4   : > { %s2601_s23 = sadd.s32 4294967294, %s3314_s16   ;;  %s3619_s21 = sadd.s32 1, %s3314_s16  }
  0xb5   : > { %s41_s1 = sadd.s32 1, %s3310_s15  ;;  %s38_s26 = ssub.s32 %s3314_s16, %s3619_s21 }
  0xb6   : > { %p48_p8 = scmp.ne.s32.totalorder %s3310_s15, %s3306_s30  ;;  %p39_p1 = scmp.eq.s32.totalorder %s38_s26, 0 }
  0xb7   : > { %p49_p3 = scmp.eq.s32.totalorder %s3314_s16, 0  ;;  %p54_p13 = scmp.ne.s32.totalorder %s3306_s30, %s3302_s29 }
  0xb8   : > { %p351_p0 = scmp.eq.s32.totalorder %s3427_s19, 1  ;;  %p4185_p5 = scmp.eq.s32.totalorder %s3427_s19, 0 }
  0xb9   : > { %s3631_s9 = scalar_select %p39_p1, %s3310_s15, %s41_s1  }
  0xba   : > { %p50_p2 = por %p49_p3, %p48_p8  ;;  %p3635_p7 = por %p4185_p5, %p54_p13 }
  0xbb   : > { %p3639_p6 = por %p351_p0, %p48_p8  ;;  %p357_p9 = scmp.eq.s32.totalorder %s2601_s23, 1 }
  0xbc   : > { %p2937_p4 = scmp.lt.s32.totalorder %s3314_s16, 2  ;;  %s484_s14 = sand.u32 1, %s3310_s15  }
  0xbd   : > { %s4187_s24 = scalar_select %p3639_p6, 1, 0 }
  0xbe   : > { %p3645_p10 = por %p357_p9, %p54_p13  ;;  %s2611_s18 = sshll.u32 %s484_s14, 6 }
  0xbf   : > { %s2706_s5 = sshll.u32 %s3314_s16, 10  ;;  %s488_s28 = scalar_lea.vmem [#allocation2], %s2611_s18 }
  0xc0   : > { %s4188_s22 = scalar_select %p3645_p10, 1, 0 }
  0xc1   : > { %s3653_s27 = scalar_lea.hbm %s4149_s0, %s2706_s5  ;;  %s496_s1 = sshll.u32 %s488_s28, 4  ;;  %s3659_s1 = int_to_ptr.vmem [resolvable:$true] %s496_s1 }
  0xc2   : > { %p3655_p11 = pnand %p2937_p4, %p50_p2  ;;  %s3661_s26 = scalar_lea.sflag [#allocation3], %s484_s14 }
  0xc3   : > { %s3202_s13 = scalar_lea.hbm %s3653_s27, 1024  ;;  %s3207_s25 = scalar_lea.hbm %s4149_s0, 2048 }
  0xc4   : > { %p3203_p12 = scmp.ne.s32.totalorder %s3653_s27, %s3202_s13  ;;  %p3204_p8 = pneg %p3655_p11 }
  0xc5   : > { %p3208_p13 = scmp.lt.u32.totalorder %s3653_s27, %s4149_s0  ;;  %p3209_p0 = scmp.lt.u32.totalorder %s3207_s25, %s3202_s13 }
  0xc6   : > { %p3205_p1 = pnand %p3204_p8, %p3203_p12  ;;  %p3211_p5 = scmp.lt.u32.totalorder %s3202_s13, %s3653_s27 }
  0xc7   : > { %p3210_p2 = por %p3209_p0, %p3208_p13 }
  0xc8   : > { %p3206_p3 = pneg %p3205_p1 }
  0xc9   : > { %p3212_p9 = por %p3211_p5, %p3210_p2 }
  0xcb   : > { %p3213_p4 = pnand %p3212_p9, %p3206_p3 }
  0xcd   : > { %3216 = shalt.err (!%p3213_p4)
}
  0xce   : > { %s3217_s14 = scalar_lea.vmem %s3659_s1, 1024  ;;  %s3325_s18 = smov [#allocation2]  }
  0xcf   : > { %p3218_p12 = scmp.ne.s32.totalorder %s3659_s1, %s3217_s14  ;;  %s3222_s5 = sshll.u32 %s3325_s18, 4  ;;  %s3223_s5 = int_to_ptr.vmem [resolvable:$false] %s3222_s5 }
  0xd0   : > { %s3224_s11 = scalar_lea.vmem %s3223_s5, 2048  ;;  %p3225_p6 = scmp.lt.s32.totalorder %s3659_s1, %s3223_s5 }
  0xd1   : > { %p3220_p1 = pnand %p3218_p12, %p3204_p8  ;;  %p3226_p13 = scmp.lt.s32.totalorder %s3224_s11, %s3217_s14 }
  0xd3   : > { %p3221_p10 = pneg %p3220_p1  ;;  %p3227_p0 = por %p3226_p13, %p3225_p6 }
  0xd5   : > { %p3228_p2 = pnand %p3227_p0, %p3221_p10 }
  0xd7   : > { %3231 = shalt.err (!%p3228_p2)
}
  0xd8   : > { %s4190_s13 = smov 4   ;;  %p4191_p8 = scmp.ne.s32.totalorder %s4180_s20, 0 }
  0xd9   : > { %2925 = dma.hbm_to_vmem [thread:$0]  (!%p3655_p11), %s3653_s27, 1024, %s3659_s1, %s3661_s26, %s4184_s6, %s4184_s6, %s4190_s13  }
  0xda   : > { %508 = sbr.rel (%p4191_p8) target bundleno = 1590 (0x636), region = 76  ;;  %s3695_s25 = sand.u32 (!%p4191_p8), 1, %s3306_s30  }
  0xdb   : > { %s2616_s28 = sshll.u32 (!%p4191_p8), %s3695_s25, 6  ;;  %s511_s14 = scalar_lea.sflag (!%p4191_p8), [#allocation3], %s3695_s25 }
  0xdc   : > { %s3699_s18 = scalar_lea.vmem (!%p4191_p8), [#allocation2], %s2616_s28 }
  0xe1   : > { %3277 = dma.done.wait (%p3635_p7), %s511_s14, 1024  }
  0xe2   : > { %3279 = vsyncadd (%p3635_p7), %s511_s14, 4294966272  ;;  %p4192_p6 = scmp.eq.s32.totalorder %s3427_s19, 0 }
  0xe4   : > { %3281 = dma.done.wait (%p4192_p6), [#allocation6], 384   ;;  %p4193_p10 = pmov %p4192_p6 }
  0xe5   : > { %p4194_p11 = pmov %p4192_p6 }
  0xe6   : > { %3283 = vsyncadd (%p4193_p10), [#allocation6], 4294966912 }
  0xe7   : > { %3285 = dma.done.wait (%p4194_p11), [#allocation9], 512   ;;  %p4195_p3 = pmov %p4192_p6 }
  0xe9   : > { %3287 = vsyncadd (%p4195_p3), [#allocation9], 4294966784  ;;  %p4196_p5 = pmov %p4195_p3 }
  0xea   : > { %p4197_p9 = pmov %p4195_p3 }
  0xeb   : > { %3289 = dma.done.wait (%p4196_p5), [#allocation12], 272  }
  0xec   : > { %3291 = vsyncadd (%p4197_p9), [#allocation12], 4294967024  ;;  %p4198_p7 = pmov %p4195_p3 }
  0xed   : > { %p4199_p4 = pmov %p4195_p3 }
  0xee   : > { %3293 = dma.done.wait (%p4198_p7), [#allocation15], 256  }
  0xef   : > { %3295 = vsyncadd (%p4199_p4), [#allocation15], 4294967040  ;;  %v2991_v0 = vld [vmem:[#allocation5] sm:$0xff]   ;;  %v592_v3 = vld [vmem:[%s3699_s18 + $0x8] sm:$0xf]  ;;  %v3326_v4 = vmov 0  }
  0xf0   : > { %v590_v1 = vld [vmem:[%s3699_s18] sm:$0xf]  ;;  %v591_v2 = vld [vmem:[%s3699_s18 + $0x4] sm:$0xf]  ;;  %2758 = vmatprep.subr.bf16.mxu0 %v2991_v0  ;;  %v593_v7 = vld [vmem:[%s3699_s18 + $0xc] sm:$0xf]  ;;  %v608_v8 = vmax.bf16 %v3326_v4, %v592_v3 }
  0xf1   : > { %v606_v5 = vmax.bf16 %v3326_v4, %v590_v1  ;;  %v607_v6 = vmax.bf16 %v3326_v4, %v591_v2  ;;  %v594_v9 = vld [vmem:[%s3699_s18 + $0x10] sm:$0xf]  ;;  %v595_v10 = vld [vmem:[%s3699_s18 + $0x14] sm:$0xf]  ;;  %2759 = vmatpush3.bf16.msra.mxu0 %v2991_v0  ;;  %vm677_vm0 = vcmask 130048   ;;  %v609_v11 = vmax.bf16 %v3326_v4, %v593_v7  ;;  %v2992_v42 = vld [vmem:[#allocation8] sm:$0xff]  }
  0xf2   : > { %v610_v12 = vmax.bf16 %v3326_v4, %v594_v9  ;;  %v611_v13 = vmax.bf16 %v3326_v4, %v595_v10  ;;  %v596_v15 = vld [vmem:[%s3699_s18 + $0x18] sm:$0xf]  ;;  %v597_v16 = vld [vmem:[%s3699_s18 + $0x1c] sm:$0xf]  ;;  %v598_v19 = vld [vmem:[%s3699_s18 + $0x20] sm:$0xf] }
  0xf3   : > { %v2626_v14 = vcombine.low %v606_v5, %v607_v6  ;;  %v2627_v17 = vcombine.low %v608_v8, %v609_v11  ;;  %v599_v20 = vld [vmem:[%s3699_s18 + $0x24] sm:$0xf]  ;;  %v612_v21 = vmax.bf16 %v3326_v4, %v596_v15  ;;  %v613_v22 = vmax.bf16 %v3326_v4, %v597_v16  ;;  %v600_v25 = vld [vmem:[%s3699_s18 + $0x28] sm:$0xf]  ;;  %v601_v26 = vld [vmem:[%s3699_s18 + $0x2c] sm:$0xf] }
  0xf4   : > { %v2628_v18 = vcombine.low %v610_v12, %v611_v13  ;;  %v614_v23 = vmax.bf16 %v3326_v4, %v598_v19  ;;  %v615_v24 = vmax.bf16 %v3326_v4, %v599_v20  ;;  %v602_v28 = vld [vmem:[%s3699_s18 + $0x30] sm:$0xf]  ;;  %v603_v29 = vld [vmem:[%s3699_s18 + $0x34] sm:$0xf]  ;;  %v616_v31 = vmax.bf16 %v3326_v4, %v600_v25  ;;  %v604_v37 = vld [vmem:[%s3699_s18 + $0x38] sm:$0xf] }
  0xf5   : > { %2760 = vmatprep.mubr.msk.bf16.mxu0 %vm677_vm0, %v2626_v14  ;;  %v2629_v27 = vcombine.low %v612_v21, %v613_v22  ;;  %v617_v32 = vmax.bf16 %v3326_v4, %v601_v26  ;;  %v618_v33 = vmax.bf16 %v3326_v4, %v602_v28  ;;  %v619_v34 = vmax.bf16 %v3326_v4, %v603_v29  ;;  %v605_v38 = vld [vmem:[%s3699_s18 + $0x3c] sm:$0xf]  ;;  %v2993_v44 = vld [vmem:[#allocation8 + $0x8] sm:$0xff]   ;;  %v3766_v45 = vld [vmem:[#allocation7] sm:$0xff]   ;;  %s4200_s1 = sld [smem:[#allocation25_spill]]  ;;  %s4201_s5 = sld [smem:[#allocation24_spill]] }
  0xf6   : > { %2761 = vmatmul.mubr.msk.bf16.vlgmr.msra.gmra.mrb[0].mxu0 %vm677_vm0, %v2627_v17  ;;  %v2630_v30 = vcombine.low %v614_v23, %v615_v24  ;;  %v620_v39 = vmax.bf16 %v3326_v4, %v604_v37  ;;  %v621_v40 = vmax.bf16 %v3326_v4, %v605_v38  ;;  %v3327_v43 = vmov 0.0   ;;  %v3774_v47 = vld [vmem:[%s4151_s2] ss:$0 sm:$0xff]  ;;  %s4202_s18 = sld [smem:[#allocation26_spill]]  ;;  %s4203_s23 = sld [smem:[#allocation27_spill]] }
  0xf7   : > { %2764 = vmatprep.mubr.msk.bf16.mxu0 %vm677_vm0, %v2628_v18  ;;  %v2631_v35 = vcombine.low %v616_v31, %v617_v32  ;;  %v2632_v36 = vcombine.low %v618_v33, %v619_v34  ;;  %2776 = vmatprep.subr.bf16.mxu1 %v3327_v43  ;;  %vm3328_vm1 = vmmov 0   ;;  %vm815_vm2 = vcmask 261120   ;;  %s2624_s26 = sshll.u32 %s3695_s25, 3  ;;  %s4204_s13 = sld [smem:[#allocation28_spill]] }
  0xf8   : > { %v2633_v41 = vcombine.low %v620_v39, %v621_v40  ;;  %2780 = vmatprep.mubr.msk.bf16.mxu1 %vm3328_vm1, %v3327_v43  ;;  %2777 = vmatpush3.bf16.msra.mxu1 %v2992_v42  ;;  %vm948_vm3 = vcmask 1041409   ;;  %vm950_vm4 = vcmask 1042434   ;;  %vm952_vm5 = vcmask 1043459   ;;  %s2702_s28 = sshll.u32 %s3427_s19, 7  ;;  %s586_s14 = scalar_lea.vmem [#allocation16], %s2624_s26 }
  0xf9   : > { %2804 = vmatprep.subr.bf16.mxu0 %v3327_v43  ;;  %2778 = vmatprep.subr.bf16.mxu1 %v3327_v43  ;;  %vm954_vm6 = vcmask 1044484   ;;  %vm956_vm7 = vcmask 1045509   ;;  %vm958_vm8 = vcmask 1046534   ;;  %vm960_vm9 = vcmask 1047559   ;;  %s2464_s20 = sshll.u32 %s586_s14, 4  ;;  %s4205_s27 = sld [smem:[#allocation29_spill]]  ;;  %s4107_s20 = int_to_ptr.vmem [resolvable:$true] %s2464_s20 }
  0xfa   : > { %s3232_s19 = scalar_lea.vmem %s4107_s20, 128  ;;  %p4206_p1 = scmp.ne.s32.totalorder %s4187_s24, 0 }
  0xfb   : > { %p3233_p12 = scmp.ne.s32.totalorder %s4107_s20, %s3232_s19  ;;  %s3330_s26 = smov [#allocation16]  }
  0xfc   : > { %2779 = vmatpush3.bf16.msra.mxu1 %v2993_v44  ;;  %s3236_s11 = sshll.u32 %s3330_s26, 4  ;;  %s3237_s11 = int_to_ptr.vmem [resolvable:$false] %s3236_s11 }
  0xfd   : > { %2784 = vmatprep.subr.bf16.mxu1 %v3766_v45  ;;  %p3234_p13 = pnand %p3233_p12, %p4206_p1  ;;  %p3239_p2 = scmp.lt.s32.totalorder %s4107_s20, %s3237_s11 }
  0xfe   : > { %2765 = vmatmul.mubr.msk.bf16.gmra.mrb[4].mxu0 %vm677_vm0, %v2629_v27 }
  0xff   : > { %2768 = vmatprep.mubr.msk.bf16.mxu0 %vm677_vm0, %v2630_v30  ;;  %p3235_p0 = pneg %p3234_p13 }
 0x106   : > { %2769 = vmatmul.mubr.msk.bf16.gmra.mrb[8].mxu0 %vm677_vm0, %v2631_v35 }
 0x107   : > { %2772 = vmatprep.mubr.msk.bf16.mxu0 %vm677_vm0, %v2632_v36 }
 0x10e   : > { %2773 = vmatmul.mubr.msk.bf16.gmra.mrb[12].mxu0 %vm677_vm0, %v2633_v41 }
 0x10f   : > { %2808 = vmatprep.mubr.msk.bf16.mxu0 %vm3328_vm1, %v3327_v43 }
 0x1c9   : > { %v2762_v46 = vpop.f32.mrb[0].mxu0 }
 0x1ca   : > { %v736_v48 = vpop.f32.mrb[1].mxu0  ;;  %v745_v50 = vadd.f32 %v2762_v46, %v3774_v47 }
 0x1cb   : > { %v2763_v49 = vpop.f32.mrb[2].mxu0  ;;  %v737_v53 = vadd.f32 %v3774_v47, %v736_v48 }
 0x1cc   : > { %v748_v51 = vadd.f32 %v2763_v49, %v3774_v47  ;;  %v739_v52 = vpop.f32.mrb[3].mxu0 }
 0x1cd   : > { %v740_v54 = vadd.f32 %v3774_v47, %v739_v52 }
 0x1ce   : > { %v800_v55 = vpack.c.bf16 %v748_v51, %v745_v50 }
 0x1cf   : > { %v799_v56 = vpack.c.bf16 %v740_v54, %v737_v53 }
 0x1d0   : > { %v3781_v57 = vmax.bf16 %v3326_v4, %v800_v55 }
 0x1d1   : > { %v3784_v58 = vmax.bf16 %v3326_v4, %v799_v56  ;;  %v2766_v59 = vpop.f32.mrb[4].mxu0 }
 0x1d2   : > { %v831_v60 = vsel %vm815_vm2, %v3781_v57, 4286644096  ;;  %v752_v61 = vpop.f32.mrb[5].mxu0  ;;  %v761_v5 = vadd.f32 %v2766_v59, %v3774_v47 }
 0x1d3   : > { %v833_v62 = vunpack.i.l.bf16 %v831_v60  ;;  %v834_v63 = vunpack.i.h.bf16 %v831_v60  ;;  %v818_v0 = vsel %vm815_vm2, %v3784_v58, 4286644096  ;;  %v2767_v1 = vpop.f32.mrb[6].mxu0  ;;  %v753_v9 = vadd.f32 %v3774_v47, %v752_v61 }
 0x1d4   : > { %v820_v2 = vunpack.i.l.bf16 %v818_v0  ;;  %v821_v3 = vunpack.i.h.bf16 %v818_v0  ;;  %v764_v6 = vadd.f32 %v2767_v1, %v3774_v47  ;;  %v755_v7 = vpop.f32.mrb[7].mxu0 }
 0x1d5   : > { %v835_v8 = vmax.f32 %v833_v62, %v834_v63  ;;  %v756_v10 = vadd.f32 %v3774_v47, %v755_v7 }
 0x1d6   : > { %v822_v11 = vmax.f32 %v820_v2, %v821_v3  ;;  %v802_v12 = vpack.c.bf16 %v764_v6, %v761_v5 }
 0x1d7   : > { %v836_v13 = vrot.slane %v835_v8, 4  ;;  %v801_v14 = vpack.c.bf16 %v756_v10, %v753_v9 }
 0x1d8   : > { %v823_v15 = vrot.slane %v822_v11, 4  ;;  %v3795_v16 = vmax.bf16 %v3326_v4, %v802_v12 }
 0x1d9   : > { %v837_v17 = vmax.f32 %v835_v8, %v836_v13  ;;  %v3798_v18 = vmax.bf16 %v3326_v4, %v801_v14  ;;  %v2770_v19 = vpop.f32.mrb[8].mxu0 }
 0x1da   : > { %v824_v20 = vmax.f32 %v822_v11, %v823_v15  ;;  %v857_v21 = vsel %vm815_vm2, %v3795_v16, 4286644096  ;;  %v777_v22 = vadd.f32 %v2770_v19, %v3774_v47  ;;  %v768_v23 = vpop.f32.mrb[9].mxu0 }
 0x1db   : > { %v838_v24 = vrot.slane %v837_v17, 2  ;;  %v859_v25 = vunpack.i.l.bf16 %v857_v21  ;;  %v860_v26 = vunpack.i.h.bf16 %v857_v21  ;;  %v844_v27 = vsel %vm815_vm2, %v3798_v18, 4286644096  ;;  %v2771_v28 = vpop.f32.mrb[10].mxu0 }
 0x1dc   : > { %v825_v29 = vrot.slane %v824_v20, 2  ;;  %v846_v30 = vunpack.i.l.bf16 %v844_v27  ;;  %v847_v31 = vunpack.i.h.bf16 %v844_v27  ;;  %v769_v32 = vadd.f32 %v3774_v47, %v768_v23  ;;  %v771_v33 = vpop.f32.mrb[11].mxu0 }
 0x1dd   : > { %v839_v34 = vmax.f32 %v837_v17, %v838_v24  ;;  %v861_v35 = vmax.f32 %v859_v25, %v860_v26  ;;  %v780_v36 = vadd.f32 %v2771_v28, %v3774_v47  ;;  %v772_v37 = vadd.f32 %v3774_v47, %v771_v33 }
 0x1de   : > { %v826_v38 = vmax.f32 %v824_v20, %v825_v29  ;;  %v848_v39 = vmax.f32 %v846_v30, %v847_v31 }
 0x1df   : > { %v840_v40 = vrot.slane %v839_v34, 1  ;;  %v862_v41 = vrot.slane %v861_v35, 4  ;;  %v804_v42 = vpack.c.bf16 %v780_v36, %v777_v22  ;;  %v803_v44 = vpack.c.bf16 %v772_v37, %v769_v32 }
 0x1e0   : > { %v827_v46 = vrot.slane %v826_v38, 1  ;;  %v849_v48 = vrot.slane %v848_v39, 4 }
 0x1e1   : > { %v841_v49 = vmax.f32 %v839_v34, %v840_v40  ;;  %v863_v50 = vmax.f32 %v861_v35, %v862_v41  ;;  %v3809_v51 = vmax.bf16 %v3326_v4, %v804_v42  ;;  %v3812_v52 = vmax.bf16 %v3326_v4, %v803_v44  ;;  %v2774_v53 = vpop.f32.mrb[12].mxu0 }
 0x1e2   : > { %v828_v54 = vmax.f32 %v826_v38, %v827_v46  ;;  %v850_v55 = vmax.f32 %v848_v39, %v849_v48  ;;  %v793_v56 = vadd.f32 %v2774_v53, %v3774_v47  ;;  %v784_v59 = vpop.f32.mrb[13].mxu0 }
 0x1e3   : > { %v842_v60 = vpack.i.bf16 %v841_v49, %v841_v49  ;;  %v864_v61 = vrot.slane %v863_v50, 2  ;;  %v883_v62 = vsel %vm815_vm2, %v3809_v51, 4286644096  ;;  %v870_v63 = vsel %vm815_vm2, %v3812_v52, 4286644096  ;;  %v2775_v0 = vpop.f32.mrb[14].mxu0 }
 0x1e4   : > { %v829_v1 = vpack.i.bf16 %v828_v54, %v828_v54  ;;  %v851_v2 = vrot.slane %v850_v55, 2  ;;  %v885_v3 = vunpack.i.l.bf16 %v883_v62  ;;  %v886_v5 = vunpack.i.h.bf16 %v883_v62  ;;  %v787_v6 = vpop.f32.mrb[15].mxu0 }
 0x1e5   : > { %v941_v7 = vunpack.c.l.b16 %v842_v60  ;;  %v865_v8 = vmax.f32 %v863_v50, %v864_v61  ;;  %v872_v9 = vunpack.i.l.bf16 %v870_v63  ;;  %v873_v10 = vunpack.i.h.bf16 %v870_v63 }
 0x1e6   : > { %v940_v11 = vunpack.c.l.b16 %v829_v1  ;;  %v852_v12 = vmax.f32 %v850_v55, %v851_v2  ;;  %v887_v13 = vmax.f32 %v885_v3, %v886_v5  ;;  %v785_v14 = vadd.f32 %v3774_v47, %v784_v59 }
 0x1e7   : > { %v866_v15 = vrot.slane %v865_v8, 1  ;;  %v874_v17 = vmax.f32 %v872_v9, %v873_v10  ;;  %v796_v19 = vadd.f32 %v2775_v0, %v3774_v47  ;;  %v788_v20 = vadd.f32 %v3774_v47, %v787_v6 }
 0x1e8   : > { %v949_v21 = vsel %vm948_vm3, %v941_v7, %v940_v11  ;;  %v853_v22 = vrot.slane %v852_v12, 1  ;;  %v888_v23 = vrot.slane %v887_v13, 4 }
 0x1e9   : > { %v867_v24 = vmax.f32 %v865_v8, %v866_v15  ;;  %v875_v25 = vrot.slane %v874_v17, 4  ;;  %v806_v26 = vpack.c.bf16 %v796_v19, %v793_v56  ;;  %v805_v27 = vpack.c.bf16 %v788_v20, %v785_v14 }
 0x1ea   : > { %v854_v28 = vmax.f32 %v852_v12, %v853_v22  ;;  %v889_v29 = vmax.f32 %v887_v13, %v888_v23 }
 0x1eb   : > { %v868_v30 = vpack.i.bf16 %v867_v24, %v867_v24  ;;  %v876_v31 = vmax.f32 %v874_v17, %v875_v25  ;;  %v3824_v32 = vmax.bf16 %v3326_v4, %v806_v26  ;;  %v3827_v33 = vmax.bf16 %v3326_v4, %v805_v27  ;;  %v2995_v25 = vld [vmem:[#allocation7 + $0x8] sm:$0xff]   ;;  %v2643_v27 = vld [vmem:[%s4201_s5] ss:$0 sm:$0xff]  ;;  %s2451_s5 = scalar_lea.sflag [#allocation4], %s3695_s25 }
 0x1ec   : > { %v855_v34 = vpack.i.bf16 %v854_v28, %v854_v28  ;;  %v890_v47 = vrot.slane %v889_v29, 2 }
 0x1ed   : > { %v877_v35 = vrot.slane %v876_v31, 2  ;;  %v909_v36 = vsel %vm815_vm2, %v3824_v32, 4286644096  ;;  %v896_v37 = vsel %vm815_vm2, %v3827_v33, 4286644096  ;;  %v943_v42 = vunpack.c.l.b16 %v868_v30 }
 0x1ee   : > { %v942_v38 = vunpack.c.l.b16 %v855_v34  ;;  %v891_v39 = vmax.f32 %v889_v29, %v890_v47  ;;  %v911_v40 = vunpack.i.l.bf16 %v909_v36  ;;  %v912_v41 = vunpack.i.h.bf16 %v909_v36 }
 0x1ef   : > { %v878_v44 = vmax.f32 %v876_v31, %v877_v35  ;;  %v898_v46 = vunpack.i.l.bf16 %v896_v37  ;;  %v899_v48 = vunpack.i.h.bf16 %v896_v37 }
 0x1f0   : > { %v892_v49 = vrot.slane %v891_v39, 1  ;;  %v913_v50 = vmax.f32 %v911_v40, %v912_v41  ;;  %v951_v53 = vsel %vm950_vm4, %v942_v38, %v949_v21 }
 0x1f1   : > { %v879_v54 = vrot.slane %v878_v44, 1  ;;  %v900_v55 = vmax.f32 %v898_v46, %v899_v48  ;;  %v953_v56 = vsel %vm952_vm5, %v943_v42, %v951_v53 }
 0x1f2   : > { %v893_v59 = vmax.f32 %v891_v39, %v892_v49  ;;  %v914_v60 = vrot.slane %v913_v50, 4 }
 0x1f3   : > { %v880_v61 = vmax.f32 %v878_v44, %v879_v54  ;;  %v901_v62 = vrot.slane %v900_v55, 4 }
 0x1f4   : > { %v894_v63 = vpack.i.bf16 %v893_v59, %v893_v59  ;;  %v915_v0 = vmax.f32 %v913_v50, %v914_v60 }
 0x1f5   : > { %v881_v1 = vpack.i.bf16 %v880_v61, %v880_v61  ;;  %v902_v2 = vmax.f32 %v900_v55, %v901_v62 }
 0x1f6   : > { %v916_v3 = vrot.slane %v915_v0, 2  ;;  %v945_v7 = vunpack.c.l.b16 %v894_v63 }
 0x1f7   : > { %v944_v5 = vunpack.c.l.b16 %v881_v1  ;;  %v903_v6 = vrot.slane %v902_v2, 2 }
 0x1f8   : > { %v917_v8 = vmax.f32 %v915_v0, %v916_v3 }
 0x1f9   : > { %v904_v9 = vmax.f32 %v902_v2, %v903_v6  ;;  %v955_v10 = vsel %vm954_vm6, %v944_v5, %v953_v56 }
 0x1fa   : > { %v918_v11 = vrot.slane %v917_v8, 1  ;;  %v957_v12 = vsel %vm956_vm7, %v945_v7, %v955_v10 }
 0x1fb   : > { %v905_v13 = vrot.slane %v904_v9, 1 }
 0x1fc   : > { %v919_v14 = vmax.f32 %v917_v8, %v918_v11 }
 0x1fd   : > { %v906_v15 = vmax.f32 %v904_v9, %v905_v13 }
 0x1fe   : > { %v920_v17 = vpack.i.bf16 %v919_v14, %v919_v14 }
 0x1ff   : > { %v907_v19 = vpack.i.bf16 %v906_v15, %v906_v15 }
 0x200   : > { %v947_v21 = vunpack.c.l.b16 %v920_v17 }
 0x201   : > { %v946_v20 = vunpack.c.l.b16 %v907_v19 }
 0x203   : > { %v959_v22 = vsel %vm958_vm8, %v946_v20, %v957_v12 }
 0x204   : > { %v961_v23 = vsel %vm960_vm9, %v947_v21, %v959_v22 }
 0x205   : > { %v962_v24 = vpack.c.b16 %v961_v23, %v961_v23 }
 0x207   : > { %2781 = vmatmul.mubr.msk.bf16.vlgmr.msra.gmra.mrb[0].mxu1 %vm815_vm2, %v962_v24 }
 0x208   : > { %2785 = vmatpush3.bf16.msra.mxu1 %v3766_v45  ;;  %2788 = vmatprep.mubr.msk.bf16.mxu1 %vm815_vm2, %v3784_v58  ;;  %v2996_v45 = vld [vmem:[#allocation10] sm:$0xff]   ;;  %v3864_v58 = vld [vmem:[%s4200_s1] sm:$0xff]  }
 0x209   : > { %2786 = vmatprep.subr.bf16.mxu1 %v2995_v25  ;;  %2805 = vmatpush3.bf16.msra.mxu0 %v2996_v45 }
 0x20a   : > { %2806 = vmatprep.subr.bf16.mxu0 %v3327_v43 }
 0x20c   : > { %2787 = vmatpush3.bf16.msra.mxu1 %v2995_v25 }
 0x20d   : > { %2832 = vmatprep.subr.bf16.mxu1 %v3327_v43 }
 0x20f   : > { %2789 = vmatmul.mubr.msk.bf16.vlgmr.msra.gmra.mrb[4].mxu1 %vm815_vm2, %v3781_v57  ;;  %v2997_v57 = vld [vmem:[#allocation10 + $0x8] sm:$0xff]  }
 0x210   : > { %2792 = vmatprep.mubr.msk.bf16.mxu1 %vm815_vm2, %v3798_v18  ;;  %2807 = vmatpush3.bf16.msra.mxu0 %v2997_v57 }
 0x211   : > { %2812 = vmatprep.subr.bf16.mxu0 %v3864_v58 }
 0x217   : > { %2793 = vmatmul.mubr.msk.bf16.gmra.mrb[8].mxu1 %vm815_vm2, %v3795_v16  ;;  %v3329_v16 = vmov 1966171168  }
 0x218   : > { %2796 = vmatprep.mubr.msk.bf16.mxu1 %vm815_vm2, %v3812_v52  ;;  %v1158_v18 = vunpack.c.l.s4 %v3329_v16 }
 0x21a   : > { %v1159_v52 = vunpack.c.0.s8 %v1158_v18 }
 0x21f   : > { %2797 = vmatmul.mubr.msk.bf16.gmra.mrb[12].mxu1 %vm815_vm2, %v3809_v51  ;;  %v1160_v51 = vlaneseq }
 0x220   : > { %2800 = vmatprep.mubr.msk.bf16.mxu1 %vm815_vm2, %v3827_v33 }
 0x221   : > { %v1161_v26 = vshrl.u32 %v1160_v51, 7 }
 0x223   : > { %v3870_v30 = vsub.s32 %v1159_v52, %v1161_v26  ;;  %v3874_v37 = vsub.s32 0, %v1161_v26 }
 0x227   : > { %2801 = vmatmul.mubr.msk.bf16.gmra.mrb[16].mxu1 %vm815_vm2, %v3824_v32 }
 0x228   : > { %2836 = vmatprep.mubr.msk.bf16.mxu1 %vm3328_vm1, %v3327_v43 }
 0x2da   : > { %v1012_v28 = vpop.f32.mrb[0].mxu1 }
 0x2db   : > { %v1013_v29 = vadd.f32 %v2643_v27, %v1012_v28  ;;  %v2782_v31 = vpop.f32.mrb[1].mxu1 }
 0x2dc   : > { %v1015_v32 = vpop.f32.mrb[2].mxu1 }
 0x2dd   : > { %v1018_v33 = vpack.c.bf16 %v1013_v29, %v1013_v29  ;;  %v2783_v34 = vpop.f32.mrb[3].mxu1 }
 0x2df   : > { %v1163_v47 = vrot.slane %v1018_v33, %v3870_v30 }
 0x2e1   : > { %v1164_v35 = vcombine.high %v1163_v47, %v1163_v47  ;;  %v1171_v36 = vrot.slane %v1163_v47, %v3870_v30 }
 0x2e2   : > { %v2790_v38 = vpop.f32.mrb[4].mxu1 }
 0x2e3   : > { %v1178_v39 = vrot.slane %v1164_v35, %v3870_v30  ;;  %v1179_v40 = vcombine.high %v1171_v36, %v1171_v36  ;;  %v1085_v41 = vpop.f32.mrb[5].mxu1  ;;  %v1182_v42 = vunpack.i.h.s16 %v1171_v36  ;;  %v2657_v44 = vpack.i.b16 %v1171_v36, %v1171_v36 }
 0x2e4   : > { %v2791_v46 = vpop.f32.mrb[6].mxu1 }
 0x2e5   : > { %v1149_v48 = vpack.c.bf16 %v2791_v46, %v2790_v38  ;;  %v1190_v49 = vpack.i.b16 %v1182_v42, %v1182_v42  ;;  %v1088_v50 = vpop.f32.mrb[7].mxu1  ;;  %v1200_v53 = vrot.slane %v2657_v44, %v3874_v37  ;;  %v1184_v54 = vunpack.i.h.s16 %v1178_v39 }
 0x2e6   : > { %v1148_v55 = vpack.c.bf16 %v1088_v50, %v1085_v41  ;;  %v2658_v56 = vpack.i.b16 %v1178_v39, %v1178_v39  ;;  %v1186_v59 = vunpack.i.h.s16 %v1179_v40  ;;  %v2659_v60 = vpack.i.b16 %v1179_v40, %v1179_v40 }
 0x2e7   : > { %v1204_v61 = vrot.slane %v1190_v49, %v3874_v37  ;;  %v1230_v62 = vpack.i.b16 %v1200_v53, %v1200_v53  ;;  %v1192_v63 = vpack.i.b16 %v1184_v54, %v1184_v54  ;;  %v1180_v0 = vcombine.high %v1178_v39, %v1178_v39 }
 0x2e8   : > { %v1208_v1 = vrot.slane %v2658_v56, %v3874_v37  ;;  %v1194_v2 = vpack.i.b16 %v1186_v59, %v1186_v59  ;;  %v1216_v9 = vrot.slane %v2659_v60, %v3874_v37 }
 0x2e9   : > { %v1237_v3 = vpack.i.b16 %v1204_v61, %v1204_v61  ;;  %v1235_v5 = vrot.slane %v1230_v62, %v3874_v37  ;;  %v1212_v6 = vrot.slane %v1192_v63, %v3874_v37  ;;  %v1188_v14 = vunpack.i.h.s16 %v1180_v0 }
 0x2ea   : > { %v2794_v7 = vpop.f32.mrb[8].mxu1  ;;  %v1244_v8 = vpack.i.b16 %v1208_v1, %v1208_v1  ;;  %v1220_v17 = vrot.slane %v1194_v2, %v3874_v37  ;;  %v2660_v19 = vpack.i.b16 %v1180_v0, %v1180_v0  ;;  %v1258_v57 = vpack.i.b16 %v1216_v9, %v1216_v9 }
 0x2eb   : > { %v1242_v10 = vrot.slane %v1237_v3, %v3874_v37  ;;  %v1285_v11 = vadd.bf16 %v1235_v5, %v1148_v55  ;;  %v1101_v12 = vpop.f32.mrb[9].mxu1  ;;  %v1251_v13 = vpack.i.b16 %v1212_v6, %v1212_v6  ;;  %v1196_v52 = vpack.i.b16 %v1188_v14, %v1188_v14 }
 0x2ec   : > { %v2795_v15 = vpop.f32.mrb[10].mxu1  ;;  %v1249_v45 = vrot.slane %v1244_v8, %v3874_v37  ;;  %v1265_v32 = vpack.i.b16 %v1220_v17, %v1220_v17  ;;  %v1224_v33 = vrot.slane %v2660_v19, %v3874_v37  ;;  %v1263_v41 = vrot.slane %v1258_v57, %v3874_v37 }
 0x2ed   : > { %v1286_v20 = vadd.bf16 %v1242_v10, %v1149_v48  ;;  %v3886_v21 = vmax.bf16 %v3326_v4, %v1285_v11  ;;  %v1151_v22 = vpack.c.bf16 %v2795_v15, %v2794_v7  ;;  %v1256_v23 = vrot.slane %v1251_v13, %v3874_v37  ;;  %v1104_v24 = vpop.f32.mrb[11].mxu1 }
 0x2ee   : > { %v1150_v25 = vpack.c.bf16 %v1104_v24, %v1101_v12  ;;  %v1228_v42 = vrot.slane %v1196_v52, %v3874_v37  ;;  %v1270_v55 = vrot.slane %v1265_v32, %v3874_v37  ;;  %v1272_v59 = vpack.i.b16 %v1224_v33, %v1224_v33 }
 0x2ef   : > { %v3891_v16 = vmax.bf16 %v3326_v4, %v1286_v20  ;;  %v1302_v18 = vsel %vm815_vm2, %v3886_v21, 4286644096  ;;  %v1288_v51 = vadd.bf16 %v1256_v23, %v1151_v22 }
 0x2f0   : > { %v1304_v26 = vunpack.i.l.bf16 %v1302_v18  ;;  %v1305_v27 = vunpack.i.h.bf16 %v1302_v18  ;;  %v1287_v28 = vadd.bf16 %v1249_v45, %v1150_v25  ;;  %v1279_v3 = vpack.i.b16 %v1228_v42, %v1228_v42 }
 0x2f1   : > { %v1315_v29 = vsel %vm815_vm2, %v3891_v16, 4286644096  ;;  %v3898_v31 = vmax.bf16 %v3326_v4, %v1288_v51  ;;  %v1277_v15 = vrot.slane %v1272_v59, %v3874_v37 }
 0x2f2   : > { %v1317_v34 = vunpack.i.l.bf16 %v1315_v29  ;;  %v1318_v47 = vunpack.i.h.bf16 %v1315_v29  ;;  %v1306_v35 = vmax.f32 %v1304_v26, %v1305_v27  ;;  %v3902_v36 = vmax.bf16 %v3326_v4, %v1287_v28  ;;  %v2798_v38 = vpop.f32.mrb[12].mxu1 }
 0x2f3   : > { %v1341_v39 = vsel %vm815_vm2, %v3898_v31, 4286644096  ;;  %v1117_v40 = vpop.f32.mrb[13].mxu1  ;;  %v1284_v23 = vrot.slane %v1279_v3, %v3874_v37 }
 0x2f4   : > { %v1319_v44 = vmax.f32 %v1317_v34, %v1318_v47  ;;  %v1307_v46 = vrot.slane %v1306_v35, 4  ;;  %v1343_v48 = vunpack.i.l.bf16 %v1341_v39  ;;  %v1344_v49 = vunpack.i.h.bf16 %v1341_v39  ;;  %v2799_v50 = vpop.f32.mrb[14].mxu1 }
 0x2f5   : > { %v1328_v53 = vsel %vm815_vm2, %v3902_v36, 4286644096  ;;  %v1153_v54 = vpack.c.bf16 %v2799_v50, %v2798_v38  ;;  %v1120_v56 = vpop.f32.mrb[15].mxu1 }
 0x2f6   : > { %v1320_v60 = vrot.slane %v1319_v44, 4  ;;  %v1308_v61 = vmax.f32 %v1306_v35, %v1307_v46  ;;  %v1345_v62 = vmax.f32 %v1343_v48, %v1344_v49  ;;  %v1330_v63 = vunpack.i.l.bf16 %v1328_v53 }
 0x2f7   : > { %v1331_v0 = vunpack.i.h.bf16 %v1328_v53  ;;  %v1290_v1 = vadd.bf16 %v1270_v55, %v1153_v54  ;;  %v1152_v2 = vpack.c.bf16 %v1120_v56, %v1117_v40 }
 0x2f8   : > { %v1321_v5 = vmax.f32 %v1319_v44, %v1320_v60  ;;  %v1309_v6 = vrot.slane %v1308_v61, 2  ;;  %v1346_v7 = vrot.slane %v1345_v62, 4 }
 0x2f9   : > { %v1332_v8 = vmax.f32 %v1330_v63, %v1331_v0  ;;  %v3912_v9 = vmax.bf16 %v3326_v4, %v1290_v1  ;;  %v1289_v10 = vadd.bf16 %v1263_v41, %v1152_v2 }
 0x2fa   : > { %v1322_v11 = vrot.slane %v1321_v5, 2  ;;  %v1310_v12 = vmax.f32 %v1308_v61, %v1309_v6  ;;  %v1347_v13 = vmax.f32 %v1345_v62, %v1346_v7  ;;  %v2802_v14 = vpop.f32.mrb[16].mxu1 }
 0x2fb   : > { %v1333_v17 = vrot.slane %v1332_v8, 4  ;;  %v1367_v19 = vsel %vm815_vm2, %v3912_v9, 4286644096  ;;  %v3918_v20 = vmax.bf16 %v3326_v4, %v1289_v10  ;;  %v1133_v22 = vpop.f32.mrb[17].mxu1 }
 0x2fc   : > { %v1323_v24 = vmax.f32 %v1321_v5, %v1322_v11  ;;  %v1311_v25 = vrot.slane %v1310_v12, 1  ;;  %v1348_v45 = vrot.slane %v1347_v13, 2  ;;  %v1369_v57 = vunpack.i.l.bf16 %v1367_v19  ;;  %v2803_v18 = vpop.f32.mrb[18].mxu1 }
 0x2fd   : > { %v1334_v51 = vmax.f32 %v1332_v8, %v1333_v17  ;;  %v1370_v52 = vunpack.i.h.bf16 %v1367_v19  ;;  %v1354_v26 = vsel %vm815_vm2, %v3918_v20, 4286644096  ;;  %v1155_v27 = vpack.c.bf16 %v2803_v18, %v2802_v14  ;;  %v1136_v28 = vpop.f32.mrb[19].mxu1 }
 0x2fe   : > { %v1324_v29 = vrot.slane %v1323_v24, 1  ;;  %v1312_v32 = vmax.f32 %v1310_v12, %v1311_v25  ;;  %v1349_v33 = vmax.f32 %v1347_v13, %v1348_v45  ;;  %v1356_v34 = vunpack.i.l.bf16 %v1354_v26 }
 0x2ff   : > { %v1335_v47 = vrot.slane %v1334_v51, 2  ;;  %v1371_v35 = vmax.f32 %v1369_v57, %v1370_v52  ;;  %v1357_v38 = vunpack.i.h.bf16 %v1354_v26  ;;  %v1292_v39 = vadd.bf16 %v1284_v23, %v1155_v27 }
 0x300   : > { %v1325_v40 = vmax.f32 %v1323_v24, %v1324_v29  ;;  %v1313_v41 = vpack.i.bf16 %v1312_v32, %v1312_v32  ;;  %v1350_v42 = vrot.slane %v1349_v33, 1  ;;  %v1154_v44 = vpack.c.bf16 %v1136_v28, %v1133_v22 }
 0x301   : > { %v1336_v46 = vmax.f32 %v1334_v51, %v1335_v47  ;;  %v1372_v48 = vrot.slane %v1371_v35, 4  ;;  %v1358_v49 = vmax.f32 %v1356_v34, %v1357_v38  ;;  %v3924_v50 = vmax.bf16 %v3326_v4, %v1292_v39 }
 0x302   : > { %v1326_v53 = vpack.i.bf16 %v1325_v40, %v1325_v40  ;;  %v1351_v54 = vmax.f32 %v1349_v33, %v1350_v42  ;;  %v1291_v55 = vadd.bf16 %v1277_v15, %v1154_v44  ;;  %v1424_v63 = vunpack.c.l.b16 %v1313_v41 }
 0x303   : > { %v1337_v56 = vrot.slane %v1336_v46, 1  ;;  %v1373_v59 = vmax.f32 %v1371_v35, %v1372_v48  ;;  %v1359_v60 = vrot.slane %v1358_v49, 4  ;;  %v1393_v61 = vsel %vm815_vm2, %v3924_v50, 4286644096 }
 0x304   : > { %v1425_v62 = vunpack.c.l.b16 %v1326_v53  ;;  %v1395_v0 = vunpack.i.l.bf16 %v1393_v61  ;;  %v1396_v1 = vunpack.i.h.bf16 %v1393_v61  ;;  %v1299_v6 = vmax.bf16 %v3326_v4, %v1291_v55 }
 0x305   : > { %v1338_v2 = vmax.f32 %v1336_v46, %v1337_v56  ;;  %v1374_v3 = vrot.slane %v1373_v59, 2  ;;  %v1360_v5 = vmax.f32 %v1358_v49, %v1359_v60  ;;  %v1352_v8 = vpack.i.bf16 %v1351_v54, %v1351_v54 }
 0x306   : > { %v1432_v7 = vsel %vm948_vm3, %v1425_v62, %v1424_v63  ;;  %v1397_v10 = vmax.f32 %v1395_v0, %v1396_v1  ;;  %v1380_v14 = vsel %vm815_vm2, %v1299_v6, 4286644096  ;;  %v2999_v62 = vld [vmem:[%s4200_s1 + $0x8] sm:$0xff]  }
 0x307   : > { %v1339_v11 = vpack.i.bf16 %v1338_v2, %v1338_v2  ;;  %v1375_v12 = vmax.f32 %v1373_v59, %v1374_v3  ;;  %v1361_v13 = vrot.slane %v1360_v5, 2  ;;  %v1382_v17 = vunpack.i.l.bf16 %v1380_v14 }
 0x308   : > { %v1398_v15 = vrot.slane %v1397_v10, 4  ;;  %v1383_v19 = vunpack.i.h.bf16 %v1380_v14  ;;  %v1427_v25 = vunpack.c.l.b16 %v1352_v8 }
 0x309   : > { %v1426_v22 = vunpack.c.l.b16 %v1339_v11  ;;  %v1376_v23 = vrot.slane %v1375_v12, 1  ;;  %v1362_v24 = vmax.f32 %v1360_v5, %v1361_v13 }
 0x30a   : > { %v1399_v45 = vmax.f32 %v1397_v10, %v1398_v15  ;;  %v1384_v57 = vmax.f32 %v1382_v17, %v1383_v19 }
 0x30b   : > { %v1433_v18 = vsel %vm950_vm4, %v1426_v22, %v1432_v7  ;;  %v1377_v51 = vmax.f32 %v1375_v12, %v1376_v23  ;;  %v1363_v52 = vrot.slane %v1362_v24, 1 }
 0x30c   : > { %v1434_v26 = vsel %vm952_vm5, %v1427_v25, %v1433_v18  ;;  %v1400_v27 = vrot.slane %v1399_v45, 2  ;;  %v1385_v28 = vrot.slane %v1384_v57, 4 }
 0x30d   : > { %v1364_v29 = vmax.f32 %v1362_v24, %v1363_v52  ;;  %v1378_v32 = vpack.i.bf16 %v1377_v51, %v1377_v51 }
 0x30e   : > { %v1401_v33 = vmax.f32 %v1399_v45, %v1400_v27  ;;  %v1386_v34 = vmax.f32 %v1384_v57, %v1385_v28 }
 0x30f   : > { %v1365_v47 = vpack.i.bf16 %v1364_v29, %v1364_v29  ;;  %v1429_v40 = vunpack.c.l.b16 %v1378_v32 }
 0x310   : > { %v1402_v35 = vrot.slane %v1401_v33, 1  ;;  %v1387_v38 = vrot.slane %v1386_v34, 2 }
 0x311   : > { %v1428_v39 = vunpack.c.l.b16 %v1365_v47 }
 0x312   : > { %v1388_v41 = vmax.f32 %v1386_v34, %v1387_v38  ;;  %v1403_v44 = vmax.f32 %v1401_v33, %v1402_v35 }
 0x313   : > { %v1435_v42 = vsel %vm954_vm6, %v1428_v39, %v1434_v26 }
 0x314   : > { %v1389_v46 = vrot.slane %v1388_v41, 1  ;;  %v1436_v48 = vsel %vm956_vm7, %v1429_v40, %v1435_v42  ;;  %v1404_v53 = vpack.i.bf16 %v1403_v44, %v1403_v44 }
 0x316   : > { %v1390_v49 = vmax.f32 %v1388_v41, %v1389_v46  ;;  %v1431_v56 = vunpack.c.l.b16 %v1404_v53 }
 0x318   : > { %v1391_v54 = vpack.i.bf16 %v1390_v49, %v1390_v49 }
 0x31a   : > { %v1430_v55 = vunpack.c.l.b16 %v1391_v54 }
 0x31c   : > { %v1437_v59 = vsel %vm958_vm8, %v1430_v55, %v1436_v48 }
 0x31d   : > { %v1438_v60 = vsel %vm960_vm9, %v1431_v56, %v1437_v59 }
 0x31e   : > { %v1439_v61 = vpack.c.b16 %v1438_v60, %v1438_v60 }
 0x320   : > { %2809 = vmatmul.mubr.msk.bf16.vlgmr.msra.gmra.mrb[16].mxu0 %vm815_vm2, %v1439_v61 }
 0x321   : > { %2813 = vmatpush3.bf16.msra.mxu0 %v3864_v58  ;;  %2816 = vmatprep.mubr.msk.bf16.mxu0 %vm815_vm2, %v3886_v21  ;;  %v3000_v58 = vld [vmem:[#allocation13] sm:$0xff]   ;;  %v3001_v21 = vld [vmem:[#allocation13 + $0x8] sm:$0xff]  }
 0x322   : > { %2814 = vmatprep.subr.bf16.mxu0 %v2999_v62  ;;  %2833 = vmatpush3.bf16.msra.mxu1 %v3000_v58 }
 0x323   : > { %2834 = vmatprep.subr.bf16.mxu1 %v3327_v43 }
 0x325   : > { %2815 = vmatpush3.bf16.msra.mxu0 %v2999_v62 }
 0x326   : > { %2860 = vmatprep.subr.bf16.mxu0 %v3327_v43  ;;  %2835 = vmatpush3.bf16.msra.mxu1 %v3001_v21 }
 0x328   : > { %2817 = vmatmul.mubr.msk.bf16.vlgmr.msra.gmra.mrb[20].mxu0 %vm815_vm2, %v3891_v16  ;;  %v3964_v16 = vld [vmem:[%s4202_s18] sm:$0xff]  }
 0x329   : > { %2820 = vmatprep.mubr.msk.bf16.mxu0 %vm815_vm2, %v3902_v36  ;;  %2840 = vmatprep.subr.bf16.mxu1 %v3964_v16 }
 0x330   : > { %2821 = vmatmul.mubr.msk.bf16.gmra.mrb[24].mxu0 %vm815_vm2, %v3898_v31  ;;  %v2661_v31 = vld [vmem:[#allocation11] ss:$0 sm:$0xff] }
 0x331   : > { %2824 = vmatprep.mubr.msk.bf16.mxu0 %vm815_vm2, %v3918_v20 }
 0x338   : > { %2825 = vmatmul.mubr.msk.bf16.gmra.mrb[28].mxu0 %vm815_vm2, %v3912_v9 }
 0x339   : > { %2828 = vmatprep.mubr.msk.bf16.mxu0 %vm815_vm2, %v1299_v6 }
 0x340   : > { %2829 = vmatmul.mubr.msk.bf16.gmra.mrb[32].mxu0 %vm815_vm2, %v3924_v50 }
 0x341   : > { %2864 = vmatprep.mubr.msk.bf16.mxu0 %vm3328_vm1, %v3327_v43 }
 0x3f3   : > { %v1489_v36 = vpop.f32.mrb[16].mxu0 }
 0x3f4   : > { %v1490_v9 = vadd.f32 %v2661_v31, %v1489_v36  ;;  %v2810_v20 = vpop.f32.mrb[17].mxu0 }
 0x3f5   : > { %v1492_v50 = vpop.f32.mrb[18].mxu0 }
 0x3f6   : > { %v1495_v63 = vpack.c.bf16 %v1490_v9, %v1490_v9  ;;  %v2811_v0 = vpop.f32.mrb[19].mxu0 }
 0x3f8   : > { %v1640_v1 = vrot.slane %v1495_v63, %v3870_v30 }
 0x3fa   : > { %v1641_v2 = vcombine.high %v1640_v1, %v1640_v1  ;;  %v1648_v3 = vrot.slane %v1640_v1, %v3870_v30 }
 0x3fb   : > { %v2818_v5 = vpop.f32.mrb[20].mxu0 }
 0x3fc   : > { %v1655_v6 = vrot.slane %v1641_v2, %v3870_v30  ;;  %v1656_v7 = vcombine.high %v1648_v3, %v1648_v3  ;;  %v1562_v8 = vpop.f32.mrb[21].mxu0  ;;  %v1659_v10 = vunpack.i.h.s16 %v1648_v3  ;;  %v2675_v11 = vpack.i.b16 %v1648_v3, %v1648_v3 }
 0x3fd   : > { %v2819_v12 = vpop.f32.mrb[22].mxu0 }
 0x3fe   : > { %v1626_v13 = vpack.c.bf16 %v2819_v12, %v2818_v5  ;;  %v1667_v14 = vpack.i.b16 %v1659_v10, %v1659_v10  ;;  %v1565_v15 = vpop.f32.mrb[23].mxu0  ;;  %v1677_v17 = vrot.slane %v2675_v11, %v3874_v37  ;;  %v1661_v19 = vunpack.i.h.s16 %v1655_v6 }
 0x3ff   : > { %v1625_v22 = vpack.c.bf16 %v1565_v15, %v1562_v8  ;;  %v2676_v23 = vpack.i.b16 %v1655_v6, %v1655_v6  ;;  %v1663_v24 = vunpack.i.h.s16 %v1656_v7  ;;  %v2677_v25 = vpack.i.b16 %v1656_v7, %v1656_v7 }
 0x400   : > { %v1681_v45 = vrot.slane %v1667_v14, %v3874_v37  ;;  %v1707_v57 = vpack.i.b16 %v1677_v17, %v1677_v17  ;;  %v1669_v18 = vpack.i.b16 %v1661_v19, %v1661_v19  ;;  %v1657_v51 = vcombine.high %v1655_v6, %v1655_v6 }
 0x401   : > { %v1685_v52 = vrot.slane %v2676_v23, %v3874_v37  ;;  %v1671_v26 = vpack.i.b16 %v1663_v24, %v1663_v24  ;;  %v1693_v34 = vrot.slane %v2677_v25, %v3874_v37 }
 0x402   : > { %v1714_v27 = vpack.i.b16 %v1681_v45, %v1681_v45  ;;  %v1712_v28 = vrot.slane %v1707_v57, %v3874_v37  ;;  %v1689_v29 = vrot.slane %v1669_v18, %v3874_v37  ;;  %v1665_v40 = vunpack.i.h.s16 %v1657_v51 }
 0x403   : > { %v2822_v32 = vpop.f32.mrb[24].mxu0  ;;  %v1721_v33 = vpack.i.b16 %v1685_v52, %v1685_v52  ;;  %v1697_v42 = vrot.slane %v1671_v26, %v3874_v37  ;;  %v2678_v44 = vpack.i.b16 %v1657_v51, %v1657_v51  ;;  %v1735_v59 = vpack.i.b16 %v1693_v34, %v1693_v34 }
 0x404   : > { %v1719_v47 = vrot.slane %v1714_v27, %v3874_v37  ;;  %v1762_v35 = vadd.bf16 %v1712_v28, %v1625_v22  ;;  %v1578_v38 = vpop.f32.mrb[25].mxu0  ;;  %v1728_v39 = vpack.i.b16 %v1689_v29, %v1689_v29  ;;  %v1673_v58 = vpack.i.b16 %v1665_v40, %v1665_v40 }
 0x405   : > { %v2823_v41 = vpop.f32.mrb[26].mxu0  ;;  %v1726_v56 = vrot.slane %v1721_v33, %v3874_v37  ;;  %v1742_v50 = vpack.i.b16 %v1697_v42, %v1697_v42  ;;  %v1701_v63 = vrot.slane %v2678_v44, %v3874_v37  ;;  %v1740_v8 = vrot.slane %v1735_v59, %v3874_v37 }
 0x406   : > { %v1763_v46 = vadd.bf16 %v1719_v47, %v1626_v13  ;;  %v3979_v48 = vmax.bf16 %v3326_v4, %v1762_v35  ;;  %v1628_v49 = vpack.c.bf16 %v2823_v41, %v2822_v32  ;;  %v1733_v53 = vrot.slane %v1728_v39, %v3874_v37  ;;  %v1581_v54 = vpop.f32.mrb[27].mxu0 }
 0x407   : > { %v1627_v55 = vpack.c.bf16 %v1581_v54, %v1578_v38  ;;  %v1705_v10 = vrot.slane %v1673_v58, %v3874_v37  ;;  %v1747_v22 = vrot.slane %v1742_v50, %v3874_v37  ;;  %v1749_v24 = vpack.i.b16 %v1701_v63, %v1701_v63 }
 0x408   : > { %v3984_v60 = vmax.bf16 %v3326_v4, %v1763_v46  ;;  %v1779_v61 = vsel %vm815_vm2, %v3979_v48, 4286644096  ;;  %v1765_v62 = vadd.bf16 %v1733_v53, %v1628_v49 }
 0x409   : > { %v1781_v21 = vunpack.i.l.bf16 %v1779_v61  ;;  %v1782_v31 = vunpack.i.h.bf16 %v1779_v61  ;;  %v1764_v36 = vadd.bf16 %v1726_v56, %v1627_v55  ;;  %v1756_v27 = vpack.i.b16 %v1705_v10, %v1705_v10 }
 0x40a   : > { %v1792_v9 = vsel %vm815_vm2, %v3984_v60, 4286644096  ;;  %v3991_v20 = vmax.bf16 %v3326_v4, %v1765_v62  ;;  %v1754_v41 = vrot.slane %v1749_v24, %v3874_v37 }
 0x40b   : > { %v1794_v0 = vunpack.i.l.bf16 %v1792_v9  ;;  %v1795_v1 = vunpack.i.h.bf16 %v1792_v9  ;;  %v1783_v2 = vmax.f32 %v1781_v21, %v1782_v31  ;;  %v3995_v3 = vmax.bf16 %v3326_v4, %v1764_v36  ;;  %v2826_v5 = vpop.f32.mrb[28].mxu0 }
 0x40c   : > { %v1818_v6 = vsel %vm815_vm2, %v3991_v20, 4286644096  ;;  %v1594_v7 = vpop.f32.mrb[29].mxu0  ;;  %v1761_v53 = vrot.slane %v1756_v27, %v3874_v37 }
 0x40d   : > { %v1796_v11 = vmax.f32 %v1794_v0, %v1795_v1  ;;  %v1784_v12 = vrot.slane %v1783_v2, 4  ;;  %v1820_v13 = vunpack.i.l.bf16 %v1818_v6  ;;  %v1821_v14 = vunpack.i.h.bf16 %v1818_v6  ;;  %v2827_v15 = vpop.f32.mrb[30].mxu0 }
 0x40e   : > { %v1805_v17 = vsel %vm815_vm2, %v3995_v3, 4286644096  ;;  %v1630_v19 = vpack.c.bf16 %v2827_v15, %v2826_v5  ;;  %v1597_v23 = vpop.f32.mrb[31].mxu0 }
 0x40f   : > { %v1797_v25 = vrot.slane %v1796_v11, 4  ;;  %v1785_v45 = vmax.f32 %v1783_v2, %v1784_v12  ;;  %v1822_v57 = vmax.f32 %v1820_v13, %v1821_v14  ;;  %v1807_v18 = vunpack.i.l.bf16 %v1805_v17 }
 0x410   : > { %v1808_v51 = vunpack.i.h.bf16 %v1805_v17  ;;  %v1767_v52 = vadd.bf16 %v1747_v22, %v1630_v19  ;;  %v1629_v26 = vpack.c.bf16 %v1597_v23, %v1594_v7 }
 0x411   : > { %v1798_v28 = vmax.f32 %v1796_v11, %v1797_v25  ;;  %v1786_v29 = vrot.slane %v1785_v45, 2  ;;  %v1823_v32 = vrot.slane %v1822_v57, 4 }
 0x412   : > { %v1809_v33 = vmax.f32 %v1807_v18, %v1808_v51  ;;  %v4005_v34 = vmax.bf16 %v3326_v4, %v1767_v52  ;;  %v1766_v47 = vadd.bf16 %v1740_v8, %v1629_v26 }
 0x413   : > { %v1799_v35 = vrot.slane %v1798_v28, 2  ;;  %v1787_v38 = vmax.f32 %v1785_v45, %v1786_v29  ;;  %v1824_v39 = vmax.f32 %v1822_v57, %v1823_v32  ;;  %v2830_v40 = vpop.f32.mrb[32].mxu0 }
 0x414   : > { %v1810_v42 = vrot.slane %v1809_v33, 4  ;;  %v1844_v44 = vsel %vm815_vm2, %v4005_v34, 4286644096  ;;  %v4011_v46 = vmax.bf16 %v3326_v4, %v1766_v47  ;;  %v1610_v49 = vpop.f32.mrb[33].mxu0 }
 0x415   : > { %v1800_v54 = vmax.f32 %v1798_v28, %v1799_v35  ;;  %v1788_v55 = vrot.slane %v1787_v38, 1  ;;  %v1825_v56 = vrot.slane %v1824_v39, 2  ;;  %v1846_v59 = vunpack.i.l.bf16 %v1844_v44  ;;  %v2831_v61 = vpop.f32.mrb[34].mxu0 }
 0x416   : > { %v1811_v62 = vmax.f32 %v1809_v33, %v1810_v42  ;;  %v1847_v58 = vunpack.i.h.bf16 %v1844_v44  ;;  %v1831_v21 = vsel %vm815_vm2, %v4011_v46, 4286644096  ;;  %v1632_v31 = vpack.c.bf16 %v2831_v61, %v2830_v40  ;;  %v1613_v36 = vpop.f32.mrb[35].mxu0 }
 0x417   : > { %v1801_v9 = vrot.slane %v1800_v54, 1  ;;  %v1789_v50 = vmax.f32 %v1787_v38, %v1788_v55  ;;  %v1826_v63 = vmax.f32 %v1824_v39, %v1825_v56  ;;  %v1833_v0 = vunpack.i.l.bf16 %v1831_v21 }
 0x418   : > { %v1812_v1 = vrot.slane %v1811_v62, 2  ;;  %v1848_v2 = vmax.f32 %v1846_v59, %v1847_v58  ;;  %v1834_v5 = vunpack.i.h.bf16 %v1831_v21  ;;  %v1769_v6 = vadd.bf16 %v1761_v53, %v1632_v31 }
 0x419   : > { %v1802_v7 = vmax.f32 %v1800_v54, %v1801_v9  ;;  %v1790_v8 = vpack.i.bf16 %v1789_v50, %v1789_v50  ;;  %v1827_v10 = vrot.slane %v1826_v63, 1  ;;  %v1631_v11 = vpack.c.bf16 %v1613_v36, %v1610_v49 }
 0x41a   : > { %v1813_v12 = vmax.f32 %v1811_v62, %v1812_v1  ;;  %v1849_v13 = vrot.slane %v1848_v2, 4  ;;  %v1835_v14 = vmax.f32 %v1833_v0, %v1834_v5  ;;  %v4017_v15 = vmax.bf16 %v3326_v4, %v1769_v6 }
 0x41b   : > { %v1803_v17 = vpack.i.bf16 %v1802_v7, %v1802_v7  ;;  %v1828_v19 = vmax.f32 %v1826_v63, %v1827_v10  ;;  %v1768_v22 = vadd.bf16 %v1754_v41, %v1631_v11  ;;  %v1901_v18 = vunpack.c.l.b16 %v1790_v8 }
 0x41c   : > { %v1814_v23 = vrot.slane %v1813_v12, 1  ;;  %v1850_v24 = vmax.f32 %v1848_v2, %v1849_v13  ;;  %v1836_v25 = vrot.slane %v1835_v14, 4  ;;  %v1870_v45 = vsel %vm815_vm2, %v4017_v15, 4286644096 }
 0x41d   : > { %v1902_v57 = vunpack.c.l.b16 %v1803_v17  ;;  %v1872_v51 = vunpack.i.l.bf16 %v1870_v45  ;;  %v1873_v52 = vunpack.i.h.bf16 %v1870_v45  ;;  %v1776_v29 = vmax.bf16 %v3326_v4, %v1768_v22 }
 0x41e   : > { %v1815_v26 = vmax.f32 %v1813_v12, %v1814_v23  ;;  %v1851_v27 = vrot.slane %v1850_v24, 2  ;;  %v1837_v28 = vmax.f32 %v1835_v14, %v1836_v25  ;;  %v1829_v33 = vpack.i.bf16 %v1828_v19, %v1828_v19 }
 0x41f   : > { %v1909_v32 = vsel %vm948_vm3, %v1902_v57, %v1901_v18  ;;  %v1874_v47 = vmax.f32 %v1872_v51, %v1873_v52  ;;  %v1857_v40 = vsel %vm815_vm2, %v1776_v29, 4286644096  ;;  %v3003_v57 = vld [vmem:[%s4202_s18 + $0x8] sm:$0xff]  }
 0x420   : > { %v1816_v35 = vpack.i.bf16 %v1815_v26, %v1815_v26  ;;  %v1852_v38 = vmax.f32 %v1850_v24, %v1851_v27  ;;  %v1838_v39 = vrot.slane %v1837_v28, 2  ;;  %v1859_v42 = vunpack.i.l.bf16 %v1857_v40 }
 0x421   : > { %v1875_v41 = vrot.slane %v1874_v47, 4  ;;  %v1860_v44 = vunpack.i.h.bf16 %v1857_v40  ;;  %v1904_v55 = vunpack.c.l.b16 %v1829_v33 }
 0x422   : > { %v1903_v49 = vunpack.c.l.b16 %v1816_v35  ;;  %v1853_v53 = vrot.slane %v1852_v38, 1  ;;  %v1839_v54 = vmax.f32 %v1837_v28, %v1838_v39 }
 0x423   : > { %v1876_v56 = vmax.f32 %v1874_v47, %v1875_v41  ;;  %v1861_v59 = vmax.f32 %v1859_v42, %v1860_v44 }
 0x424   : > { %v1910_v61 = vsel %vm950_vm4, %v1903_v49, %v1909_v32  ;;  %v1854_v62 = vmax.f32 %v1852_v38, %v1853_v53  ;;  %v1840_v58 = vrot.slane %v1839_v54, 1 }
 0x425   : > { %v1911_v21 = vsel %vm952_vm5, %v1904_v55, %v1910_v61  ;;  %v1877_v31 = vrot.slane %v1876_v56, 2  ;;  %v1862_v36 = vrot.slane %v1861_v59, 4 }
 0x426   : > { %v1841_v9 = vmax.f32 %v1839_v54, %v1840_v58  ;;  %v1855_v50 = vpack.i.bf16 %v1854_v62, %v1854_v62 }
 0x427   : > { %v1878_v63 = vmax.f32 %v1876_v56, %v1877_v31  ;;  %v1863_v0 = vmax.f32 %v1861_v59, %v1862_v36 }
 0x428   : > { %v1842_v1 = vpack.i.bf16 %v1841_v9, %v1841_v9  ;;  %v1906_v7 = vunpack.c.l.b16 %v1855_v50 }
 0x429   : > { %v1879_v2 = vrot.slane %v1878_v63, 1  ;;  %v1864_v5 = vrot.slane %v1863_v0, 2 }
 0x42a   : > { %v1905_v6 = vunpack.c.l.b16 %v1842_v1 }
 0x42b   : > { %v1865_v8 = vmax.f32 %v1863_v0, %v1864_v5  ;;  %v1880_v11 = vmax.f32 %v1878_v63, %v1879_v2 }
 0x42c   : > { %v1912_v10 = vsel %vm954_vm6, %v1905_v6, %v1911_v21 }
 0x42d   : > { %v1866_v12 = vrot.slane %v1865_v8, 1  ;;  %v1913_v13 = vsel %vm956_vm7, %v1906_v7, %v1912_v10  ;;  %v1881_v17 = vpack.i.bf16 %v1880_v11, %v1880_v11 }
 0x42f   : > { %v1867_v14 = vmax.f32 %v1865_v8, %v1866_v12  ;;  %v1908_v23 = vunpack.c.l.b16 %v1881_v17 }
 0x431   : > { %v1868_v19 = vpack.i.bf16 %v1867_v14, %v1867_v14 }
 0x433   : > { %v1907_v22 = vunpack.c.l.b16 %v1868_v19 }
 0x435   : > { %v1914_v24 = vsel %vm958_vm8, %v1907_v22, %v1913_v13 }
 0x436   : > { %v1915_v25 = vsel %vm960_vm9, %v1908_v23, %v1914_v24 }
 0x437   : > { %v1916_v45 = vpack.c.b16 %v1915_v25, %v1915_v25 }
 0x439   : > { %2837 = vmatmul.mubr.msk.bf16.vlgmr.msra.gmra.mrb[20].mxu1 %vm815_vm2, %v1916_v45 }
 0x43a   : > { %2841 = vmatpush3.bf16.msra.mxu1 %v3964_v16  ;;  %2844 = vmatprep.mubr.msk.bf16.mxu1 %vm815_vm2, %v3979_v48  ;;  %v3004_v16 = vld [vmem:[#allocation14] sm:$0xff]   ;;  %v3005_v48 = vld [vmem:[#allocation14 + $0x8] sm:$0xff]  }
 0x43b   : > { %2842 = vmatprep.subr.bf16.mxu1 %v3003_v57  ;;  %2861 = vmatpush3.bf16.msra.mxu0 %v3004_v16 }
 0x43c   : > { %2862 = vmatprep.subr.bf16.mxu0 %v3327_v43 }
 0x43e   : > { %2843 = vmatpush3.bf16.msra.mxu1 %v3003_v57 }
 0x43f   : > { %2863 = vmatpush3.bf16.msra.mxu0 %v3005_v48 }
 0x441   : > { %2845 = vmatmul.mubr.msk.bf16.vlgmr.msra.gmra.mrb[24].mxu1 %vm815_vm2, %v3984_v60  ;;  %v2679_v60 = vld [vmem:[%s4203_s23] ss:$0 sm:$0xff]  ;;  %s4105_s23 = scalar_lea.hbm %s4205_s27, %s2702_s28 }
 0x442   : > { %2848 = vmatprep.mubr.msk.bf16.mxu1 %vm815_vm2, %v3995_v3 }
 0x449   : > { %2849 = vmatmul.mubr.msk.bf16.gmra.mrb[28].mxu1 %vm815_vm2, %v3991_v20 }
 0x44a   : > { %2852 = vmatprep.mubr.msk.bf16.mxu1 %vm815_vm2, %v4011_v46 }
 0x451   : > { %2853 = vmatmul.mubr.msk.bf16.gmra.mrb[32].mxu1 %vm815_vm2, %v4005_v34 }
 0x452   : > { %2856 = vmatprep.mubr.msk.bf16.mxu1 %vm815_vm2, %v1776_v29 }
 0x459   : > { %2857 = vmatmul.mubr.msk.bf16.gmra.mrb[36].mxu1 %vm815_vm2, %v4017_v15 }
 0x50c   : > { %v1966_v20 = vpop.f32.mrb[20].mxu1 }
 0x50d   : > { %v1967_v3 = vadd.f32 %v2679_v60, %v1966_v20  ;;  %v2838_v46 = vpop.f32.mrb[21].mxu1 }
 0x50e   : > { %v1969_v18 = vpop.f32.mrb[22].mxu1 }
 0x50f   : > { %v1972_v34 = vpack.c.bf16 %v1967_v3, %v1967_v3  ;;  %v2839_v51 = vpop.f32.mrb[23].mxu1 }
 0x511   : > { %v2117_v52 = vrot.slane %v1972_v34, %v3870_v30 }
 0x513   : > { %v2118_v26 = vcombine.high %v2117_v52, %v2117_v52  ;;  %v2125_v15 = vrot.slane %v2117_v52, %v3870_v30 }
 0x514   : > { %v2846_v27 = vpop.f32.mrb[24].mxu1 }
 0x515   : > { %v2132_v28 = vrot.slane %v2118_v26, %v3870_v30  ;;  %v2133_v43 = vcombine.high %v2125_v15, %v2125_v15  ;;  %v2039_v29 = vpop.f32.mrb[25].mxu1  ;;  %v2136_v32 = vunpack.i.h.s16 %v2125_v15  ;;  %v2693_v33 = vpack.i.b16 %v2125_v15, %v2125_v15 }
 0x516   : > { %v2847_v47 = vpop.f32.mrb[26].mxu1 }
 0x517   : > { %v2103_v35 = vpack.c.bf16 %v2847_v47, %v2846_v27  ;;  %v2144_v38 = vpack.i.b16 %v2136_v32, %v2136_v32  ;;  %v2042_v39 = vpop.f32.mrb[27].mxu1  ;;  %v2154_v40 = vrot.slane %v2693_v33, %v3874_v37  ;;  %v2138_v41 = vunpack.i.h.s16 %v2132_v28 }
 0x518   : > { %v2102_v42 = vpack.c.bf16 %v2042_v39, %v2039_v29  ;;  %v2694_v44 = vpack.i.b16 %v2132_v28, %v2132_v28  ;;  %v2140_v49 = vunpack.i.h.s16 %v2133_v43  ;;  %v2695_v53 = vpack.i.b16 %v2133_v43, %v2133_v43 }
 0x519   : > { %v2158_v54 = vrot.slane %v2144_v38, %v3874_v37  ;;  %v2184_v55 = vpack.i.b16 %v2154_v40, %v2154_v40  ;;  %v2146_v56 = vpack.i.b16 %v2138_v41, %v2138_v41  ;;  %v2134_v30 = vcombine.high %v2132_v28, %v2132_v28 }
 0x51a   : > { %v2162_v59 = vrot.slane %v2694_v44, %v3874_v37  ;;  %v2148_v61 = vpack.i.b16 %v2140_v49, %v2140_v49  ;;  %v2170_v9 = vrot.slane %v2695_v53, %v3874_v37 }
 0x51b   : > { %v2191_v62 = vpack.i.b16 %v2158_v54, %v2158_v54  ;;  %v2189_v58 = vrot.slane %v2184_v55, %v3874_v37  ;;  %v2166_v21 = vrot.slane %v2146_v56, %v3874_v37  ;;  %v2142_v2 = vunpack.i.h.s16 %v2134_v30 }
 0x51c   : > { %v2850_v31 = vpop.f32.mrb[28].mxu1  ;;  %v2198_v36 = vpack.i.b16 %v2162_v59, %v2162_v59  ;;  %v2174_v6 = vrot.slane %v2148_v61, %v3874_v37  ;;  %v2696_v7 = vpack.i.b16 %v2134_v30, %v2134_v30  ;;  %v2212_v19 = vpack.i.b16 %v2170_v9, %v2170_v9 }
 0x51d   : > { %v2196_v50 = vrot.slane %v2191_v62, %v3874_v37  ;;  %v2239_v63 = vadd.bf16 %v2189_v58, %v2102_v42  ;;  %v2055_v0 = vpop.f32.mrb[29].mxu1  ;;  %v2205_v1 = vpack.i.b16 %v2166_v21, %v2166_v21  ;;  %v2150_v25 = vpack.i.b16 %v2142_v2, %v2142_v2 }
 0x51e   : > { %v2851_v5 = vpop.f32.mrb[30].mxu1  ;;  %v2203_v17 = vrot.slane %v2198_v36, %v3874_v37  ;;  %v2219_v20 = vpack.i.b16 %v2174_v6, %v2174_v6  ;;  %v2178_v3 = vrot.slane %v2696_v7, %v3874_v37  ;;  %v2217_v27 = vrot.slane %v2212_v19, %v3874_v37 }
 0x51f   : > { %v2240_v8 = vadd.bf16 %v2196_v50, %v2103_v35  ;;  %v2247_v10 = vmax.bf16 %v3326_v4, %v2239_v63  ;;  %v2105_v11 = vpack.c.bf16 %v2851_v5, %v2850_v31  ;;  %v2210_v12 = vrot.slane %v2205_v1, %v3874_v37  ;;  %v2058_v13 = vpop.f32.mrb[31].mxu1 }
 0x520   : > { %v2104_v14 = vpack.c.bf16 %v2058_v13, %v2055_v0  ;;  %v2182_v28 = vrot.slane %v2150_v25, %v3874_v37  ;;  %v2224_v39 = vrot.slane %v2219_v20, %v3874_v37  ;;  %v2226_v41 = vpack.i.b16 %v2178_v3, %v2178_v3 }
 0x521   : > { %v2248_v22 = vmax.bf16 %v3326_v4, %v2240_v8  ;;  %v2256_v23 = vsel %vm815_vm2, %v2247_v10, 4286644096  ;;  %v2242_v24 = vadd.bf16 %v2210_v12, %v2105_v11 }
 0x522   : > { %v2258_v45 = vunpack.i.l.bf16 %v2256_v23  ;;  %v2259_v57 = vunpack.i.h.bf16 %v2256_v23  ;;  %v2241_v16 = vadd.bf16 %v2203_v17, %v2104_v14  ;;  %v2233_v30 = vpack.i.b16 %v2182_v28, %v2182_v28 }
 0x523   : > { %v2269_v48 = vsel %vm815_vm2, %v2248_v22, 4286644096  ;;  %v2250_v60 = vmax.bf16 %v3326_v4, %v2242_v24  ;;  %v2231_v0 = vrot.slane %v2226_v41, %v3874_v37 }
 0x524   : > { %v2271_v46 = vunpack.i.l.bf16 %v2269_v48  ;;  %v2272_v18 = vunpack.i.h.bf16 %v2269_v48  ;;  %v2260_v34 = vmax.f32 %v2258_v45, %v2259_v57  ;;  %v2249_v51 = vmax.bf16 %v3326_v4, %v2241_v16  ;;  %v2854_v52 = vpop.f32.mrb[32].mxu1 }
 0x525   : > { %v2295_v26 = vsel %vm815_vm2, %v2250_v60, 4286644096  ;;  %v2071_v15 = vpop.f32.mrb[33].mxu1  ;;  %v2238_v7 = vrot.slane %v2233_v30, %v3874_v37 }
 0x526   : > { %v2273_v43 = vmax.f32 %v2271_v46, %v2272_v18  ;;  %v2261_v29 = vrot.slane %v2260_v34, 4  ;;  %v2297_v32 = vunpack.i.l.bf16 %v2295_v26  ;;  %v2298_v33 = vunpack.i.h.bf16 %v2295_v26  ;;  %v2855_v47 = vpop.f32.mrb[34].mxu1 }
 0x527   : > { %v2282_v35 = vsel %vm815_vm2, %v2249_v51, 4286644096  ;;  %v2107_v38 = vpack.c.bf16 %v2855_v47, %v2854_v52  ;;  %v2074_v40 = vpop.f32.mrb[35].mxu1 }
 0x528   : > { %v2274_v42 = vrot.slane %v2273_v43, 4  ;;  %v2262_v44 = vmax.f32 %v2260_v34, %v2261_v29  ;;  %v2299_v49 = vmax.f32 %v2297_v32, %v2298_v33  ;;  %v2284_v53 = vunpack.i.l.bf16 %v2282_v35 }
 0x529   : > { %v2285_v54 = vunpack.i.h.bf16 %v2282_v35  ;;  %v2244_v55 = vadd.bf16 %v2224_v39, %v2107_v38  ;;  %v2106_v56 = vpack.c.bf16 %v2074_v40, %v2071_v15 }
 0x52a   : > { %v2275_v59 = vmax.f32 %v2273_v43, %v2274_v42  ;;  %v2263_v61 = vrot.slane %v2262_v44, 2  ;;  %v2300_v62 = vrot.slane %v2299_v49, 4 }
 0x52b   : > { %v2286_v58 = vmax.f32 %v2284_v53, %v2285_v54  ;;  %v2252_v21 = vmax.bf16 %v3326_v4, %v2244_v55  ;;  %v2243_v31 = vadd.bf16 %v2217_v27, %v2106_v56 }
 0x52c   : > { %v2276_v36 = vrot.slane %v2275_v59, 2  ;;  %v2264_v9 = vmax.f32 %v2262_v44, %v2263_v61  ;;  %v2301_v50 = vmax.f32 %v2299_v49, %v2300_v62  ;;  %v2858_v63 = vpop.f32.mrb[36].mxu1 }
 0x52d   : > { %v2287_v1 = vrot.slane %v2286_v58, 4  ;;  %v2321_v2 = vsel %vm815_vm2, %v2252_v21, 4286644096  ;;  %v2251_v5 = vmax.bf16 %v3326_v4, %v2243_v31  ;;  %v2087_v6 = vpop.f32.mrb[37].mxu1 }
 0x52e   : > { %v2277_v8 = vmax.f32 %v2275_v59, %v2276_v36  ;;  %v2265_v10 = vrot.slane %v2264_v9, 1  ;;  %v2302_v11 = vrot.slane %v2301_v50, 2  ;;  %v2323_v12 = vunpack.i.l.bf16 %v2321_v2  ;;  %v2859_v13 = vpop.f32.mrb[38].mxu1 }
 0x52f   : > { %v2288_v14 = vmax.f32 %v2286_v58, %v2287_v1  ;;  %v2324_v17 = vunpack.i.h.bf16 %v2321_v2  ;;  %v2308_v19 = vsel %vm815_vm2, %v2251_v5, 4286644096  ;;  %v2109_v22 = vpack.c.bf16 %v2859_v13, %v2858_v63  ;;  %v2090_v23 = vpop.f32.mrb[39].mxu1 }
 0x530   : > { %v2278_v24 = vrot.slane %v2277_v8, 1  ;;  %v2266_v25 = vmax.f32 %v2264_v9, %v2265_v10  ;;  %v2303_v45 = vmax.f32 %v2301_v50, %v2302_v11  ;;  %v2310_v57 = vunpack.i.l.bf16 %v2308_v19 }
 0x531   : > { %v2289_v16 = vrot.slane %v2288_v14, 2  ;;  %v2325_v48 = vmax.f32 %v2323_v12, %v2324_v17  ;;  %v2311_v60 = vunpack.i.h.bf16 %v2308_v19  ;;  %v2246_v20 = vadd.bf16 %v2238_v7, %v2109_v22 }
 0x532   : > { %v2279_v37 = vmax.f32 %v2277_v8, %v2278_v24  ;;  %v2267_v3 = vpack.i.bf16 %v2266_v25, %v2266_v25  ;;  %v2304_v46 = vrot.slane %v2303_v45, 1  ;;  %v2108_v18 = vpack.c.bf16 %v2090_v23, %v2087_v6 }
 0x533   : > { %v2290_v34 = vmax.f32 %v2288_v14, %v2289_v16  ;;  %v2326_v51 = vrot.slane %v2325_v48, 4  ;;  %v2312_v52 = vmax.f32 %v2310_v57, %v2311_v60  ;;  %v2254_v26 = vmax.bf16 %v3326_v4, %v2246_v20 }
 0x534   : > { %v2280_v15 = vpack.i.bf16 %v2279_v37, %v2279_v37  ;;  %v2305_v27 = vmax.f32 %v2303_v45, %v2304_v46  ;;  %v2245_v28 = vadd.bf16 %v2231_v0, %v2108_v18  ;;  %v2378_v35 = vunpack.c.l.b16 %v2267_v3  ;;  %v2697_v18 = vld [vmem:[%s4204_s13] ss:$0 sm:$0xff]  ;;  %s3238_s13 = scalar_lea.vmem %s3237_s11, 256 }
 0x535   : > { %v2291_v43 = vrot.slane %v2290_v34, 1  ;;  %v2327_v29 = vmax.f32 %v2325_v48, %v2326_v51  ;;  %v2313_v32 = vrot.slane %v2312_v52, 4  ;;  %v2347_v33 = vsel %vm815_vm2, %v2254_v26, 4286644096  ;;  %p3240_p8 = scmp.lt.s32.totalorder %s3238_s13, %s3232_s19 }
 0x536   : > { %v2379_v47 = vunpack.c.l.b16 %v2280_v15  ;;  %v2349_v38 = vunpack.i.l.bf16 %v2347_v33  ;;  %v2350_v39 = vunpack.i.h.bf16 %v2347_v33  ;;  %v2253_v44 = vmax.bf16 %v3326_v4, %v2245_v28 }
 0x537   : > { %v2292_v40 = vmax.f32 %v2290_v34, %v2291_v43  ;;  %v2328_v41 = vrot.slane %v2327_v29, 2  ;;  %v2314_v42 = vmax.f32 %v2312_v52, %v2313_v32  ;;  %v2306_v53 = vpack.i.bf16 %v2305_v27, %v2305_v27  ;;  %p3241_p6 = por %p3240_p8, %p3239_p2 }
 0x538   : > { %v2386_v49 = vsel %vm948_vm3, %v2379_v47, %v2378_v35  ;;  %v2351_v54 = vmax.f32 %v2349_v38, %v2350_v39  ;;  %v2334_v59 = vsel %vm815_vm2, %v2253_v44, 4286644096 }
 0x539   : > { %v2293_v55 = vpack.i.bf16 %v2292_v40, %v2292_v40  ;;  %v2329_v56 = vmax.f32 %v2327_v29, %v2328_v41  ;;  %v2315_v30 = vrot.slane %v2314_v42, 2  ;;  %v2336_v62 = vunpack.i.l.bf16 %v2334_v59  ;;  %p3242_p10 = pnand %p3241_p6, %p3235_p0 }
 0x53a   : > { %v2352_v61 = vrot.slane %v2351_v54, 4  ;;  %v2337_v58 = vunpack.i.h.bf16 %v2334_v59  ;;  %v2381_v9 = vunpack.c.l.b16 %v2306_v53 }
 0x53b   : > { %v2380_v21 = vunpack.c.l.b16 %v2293_v55  ;;  %v2330_v31 = vrot.slane %v2329_v56, 1  ;;  %v2316_v36 = vmax.f32 %v2314_v42, %v2315_v30 }
 0x53c   : > { %v2353_v50 = vmax.f32 %v2351_v54, %v2352_v61  ;;  %v2338_v63 = vmax.f32 %v2336_v62, %v2337_v58 }
 0x53d   : > { %v2387_v4 = vsel %vm950_vm4, %v2380_v21, %v2386_v49  ;;  %v2331_v0 = vmax.f32 %v2329_v56, %v2330_v31  ;;  %v2317_v1 = vrot.slane %v2316_v36, 1 }
 0x53e   : > { %v2388_v2 = vsel %vm952_vm5, %v2381_v9, %v2387_v4  ;;  %v2354_v5 = vrot.slane %v2353_v50, 2  ;;  %v2339_v6 = vrot.slane %v2338_v63, 4 }
 0x53f   : > { %v2318_v7 = vmax.f32 %v2316_v36, %v2317_v1  ;;  %v2332_v8 = vpack.i.bf16 %v2331_v0, %v2331_v0 }
 0x540   : > { %v2355_v10 = vmax.f32 %v2353_v50, %v2354_v5  ;;  %v2340_v11 = vmax.f32 %v2338_v63, %v2339_v6 }
 0x541   : > { %v2319_v12 = vpack.i.bf16 %v2318_v7, %v2318_v7  ;;  %v2383_v19 = vunpack.c.l.b16 %v2332_v8 }
 0x542   : > { %v2356_v13 = vrot.slane %v2355_v10, 1  ;;  %v2341_v14 = vrot.slane %v2340_v11, 2 }
 0x543   : > { %v2382_v17 = vunpack.c.l.b16 %v2319_v12 }
 0x544   : > { %v2342_v22 = vmax.f32 %v2340_v11, %v2341_v14  ;;  %v2357_v24 = vmax.f32 %v2355_v10, %v2356_v13 }
 0x545   : > { %v2389_v23 = vsel %vm954_vm6, %v2382_v17, %v2388_v2 }
 0x546   : > { %v2343_v25 = vrot.slane %v2342_v22, 1  ;;  %v2390_v45 = vsel %vm956_vm7, %v2383_v19, %v2389_v23  ;;  %v2358_v16 = vpack.i.bf16 %v2357_v24, %v2357_v24 }
 0x548   : > { %v2344_v57 = vmax.f32 %v2342_v22, %v2343_v25  ;;  %v2385_v20 = vunpack.c.l.b16 %v2358_v16 }
 0x54a   : > { %v2345_v48 = vpack.i.bf16 %v2344_v57, %v2344_v57 }
 0x54c   : > { %v2384_v60 = vunpack.c.l.b16 %v2345_v48 }
 0x54e   : > { %v2391_v37 = vsel %vm958_vm8, %v2384_v60, %v2390_v45 }
 0x54f   : > { %v2392_v3 = vsel %vm960_vm9, %v2385_v20, %v2391_v37 }
 0x550   : > { %v2393_v46 = vpack.c.b16 %v2392_v3, %v2392_v3 }
 0x552   : > { %2865 = vmatmul.mubr.msk.bf16.vlgmr.msra.gmra.mrb[36].mxu0 %vm815_vm2, %v2393_v46 }
 0x625   : > { %v2443_v34 = vpop.f32.mrb[36].mxu0 }
 0x626   : > { %v2444_v51 = vadd.f32 %v2697_v18, %v2443_v34  ;;  %v2866_v52 = vpop.f32.mrb[37].mxu0 }
 0x627   : > { %v2446_v26 = vpop.f32.mrb[38].mxu0 }
 0x628   : > { %2449 = vst [vmem:[%s586_s14] sm:$0xff] %v2444_v51  ;;  %v2867_v15 = vpop.f32.mrb[39].mxu0 }
 0x629   : > { %3245 = shalt.err (!%p3242_p10)
}
 0x62a   : > { %s3246_s25 = scalar_lea.hbm %s4105_s23, 128  ;;  %s3250_s6 = scalar_lea.hbm %s4205_s27, 256 }
 0x62b   : > { %p3247_p11 = scmp.ne.s32.totalorder %s4105_s23, %s3246_s25  ;;  %p3251_p9 = scmp.lt.u32.totalorder %s4105_s23, %s4205_s27 }
 0x62c   : > { %p3252_p7 = scmp.lt.u32.totalorder %s3250_s6, %s3246_s25  ;;  %p3254_p12 = scmp.lt.u32.totalorder %s3246_s25, %s4105_s23 }
 0x62d   : > { %p3248_p3 = pnand %p3247_p11, %p4206_p1 }
 0x62e   : > { %p3253_p4 = por %p3252_p7, %p3251_p9 }
 0x62f   : > { %p3249_p5 = pneg %p3248_p3 }
 0x630   : > { %p3255_p13 = por %p3254_p12, %p3253_p4 }
 0x632   : > { %p3256_p0 = pnand %p3255_p13, %p3249_p5 }
 0x634   : > { %3259 = shalt.err (!%p3256_p0)
}
 0x635   : > { %2898 = dma.vmem_to_hbm [thread:$0]  (%p4206_p1), %s4107_s20, 128, %s4105_s23, %s2451_s5  }
 0x636 PF: > { %s2476_s19 = sand.u32 1, %s3302_s29   ;;  %p4207_p2 = scmp.ne.s32.totalorder %s4188_s22, 0 }
 0x637   : > { %p4208_p8 = scmp.ge.s32.totalorder %s3314_s16, 2  ;;  %s2477_s11 = scalar_lea.sflag [#allocation4], %s2476_s19 }
 0x639   : > { %p2927_p6 = pnand %p4208_p8, %p4207_p2 }
 0x63b   : > { %3297 = dma.done.wait (!%p2927_p6), %s2477_s11, 128  }
 0x63c   : > { %3299 = vsyncadd (!%p2927_p6), %s2477_s11, 4294967168  ;;  %p31_p10 = scmp.ge.s32.totalorder %s3619_s21, 4   ;;  %s4209_s29 = smov %s3306_s30 }
 0x63d   : > { %s4210_s30 = smov %s3310_s15  ;;  %s4211_s15 = smov %s3631_s9 }
 0x63e   : > { %s4212_s16 = smov %s3619_s21  ;;  %33 = sbr.rel (!%p31_p10) target bundleno = 17 (0x11), region = 149 }
 0x645   :  { %2482 = vsyncpa [#allocation3], 1 }
 0x646   :  { %2484 = vsyncpa [#allocation3 + $0x1], 1 }
 0x647   :  { %2485 = vsyncpa [#allocation6], 1 }
 0x648   :  { %2486 = vsyncpa [#allocation9], 1 }
 0x649   :  { %2487 = vsyncpa [#allocation12], 1 }
 0x64a   :  { %2488 = vsyncpa [#allocation15], 1 }
 0x64b   :  { %2489 = vsyncpa [#allocation4], 1 }
 0x64c   :  { %2491 = vsyncpa [#allocation4 + $0x1], 1 }

</bundles_post_ra>
